<compile_context>
chip_gen: v6e
topology: v6e:2x2x1
jax: 0.10.0
libtpu: 0.0.40
codegen_flags: <defaults>
</compile_context>

<pallas_src>
from functools import partial

import jax
import jax.numpy as jnp
from jax import lax
from jax.experimental import pallas as pl
from jax.experimental.pallas import tpu as pltpu

NEG_FILL = float(-(2 ** 32) + 1)  # masked_fill value used by the reference module


# ---------------------------------------------------------------------------
# Chip-aware sizing helpers
# ---------------------------------------------------------------------------

def _vmem_limit_bytes():
    """Scoped-VMEM limit sized to the chip (v5e/v6e: 128 MiB, v7x: 64 MiB)."""
    try:
        cap = int(pltpu.get_tpu_info().vmem_capacity_bytes)
    except Exception:
        cap = 64 * 1024 * 1024  # conservative (v7x-sized) fallback
    return max(32 * 1024 * 1024, min((cap * 3) // 4, 96 * 1024 * 1024))


def _sublane_min(dtype):
    # Minimum useful second-minor tile per dtype (sub-32-bit packs sublanes).
    return {4: 8, 2: 16, 1: 32}.get(jnp.dtype(dtype).itemsize, 8)


def _tile_candidates(T, min_tile):
    cands = [c for c in (512, 256, 128, 64, 32, 16, 8)
             if c >= min_tile and T % c == 0]
    return cands or [T]


def _mask_block_bytes(arr, Tq, tq, Tk, tk):
    """Double-buffered VMEM bytes for one (possibly un-broadcast) mask block."""
    if arr is None:
        return 0
    _, mq, mk = arr.shape
    bq = tq if mq == Tq else 1
    bk = tk if (tk is not None and mk == Tk) else mk
    return 2 * bq * bk * arr.dtype.itemsize


def _pick_tq_full(Tq, Tk, D, q_dt, kv_dt, out_dt, attn_dt,
                  mask_arr, qmask_arr, budget):
    """Largest q tile whose full-Tk working set fits the VMEM budget."""
    cands = _tile_candidates(Tq, _sublane_min(q_dt))
    kv_bytes = 2 * 2 * Tk * D * jnp.dtype(kv_dt).itemsize  # K + V, double-buffered
    for tq in cands:
        fp = kv_bytes
        fp += 2 * tq * D * (jnp.dtype(q_dt).itemsize + jnp.dtype(out_dt).itemsize)
        fp += 2 * tq * Tk * jnp.dtype(attn_dt).itemsize     # attn writeback
        fp += _mask_block_bytes(mask_arr, Tq, tq, Tk, None)
        fp += _mask_block_bytes(qmask_arr, Tq, tq, Tk, None)
        fp += 3 * tq * Tk * 4                               # f32 scores/e/p temps
        if fp <= budget:
            return tq
    return cands[-1]


def _pick_tiles_flash(Tq, Tk, D, q_dt, kv_dt, out_dt, mask_arr, qmask_arr, budget):
    """Largest (tq, tk) pair (tq preferred) fitting the VMEM budget."""
    q_cands = _tile_candidates(Tq, _sublane_min(q_dt))
    k_cands = [c for c in (512, 256, 128) if Tk % c == 0] or [Tk]
    for tq in q_cands:
        for tk in k_cands:
            fp = 2 * 2 * tk * D * jnp.dtype(kv_dt).itemsize          # K + V tiles
            fp += 2 * tq * D * (jnp.dtype(q_dt).itemsize + jnp.dtype(out_dt).itemsize)
            fp += _mask_block_bytes(mask_arr, Tq, tq, Tk, tk)
            fp += _mask_block_bytes(qmask_arr, Tq, tq, Tk, tk)
            fp += (tq * D + 2 * tq) * 4                              # m/l/acc scratch
            fp += 3 * tq * tk * 4 + 2 * tq * D * 4                   # f32 temps
            if fp <= budget:
                return tq, tk
    return q_cands[-1], k_cands[-1]


# ---------------------------------------------------------------------------
# Mask plumbing
# ---------------------------------------------------------------------------

def _normalize_mask3d(m, B, Tq, Tk, prefer="k"):
    """Bring a mask into [B, mq, mk] with mq in {1, Tq} and mk in {1, Tk}."""
    m = jnp.asarray(m)
    if m.ndim == 2:
        if prefer == "q" and m.shape == (B, Tq):
            m = m[:, :, None]          # per-query mask
        elif prefer == "k" and m.shape == (B, Tk):
            m = m[:, None, :]          # per-key mask
        elif m.shape == (B, Tq):
            m = m[:, :, None]
        elif m.shape == (B, Tk):
            m = m[:, None, :]
    if (m.ndim != 3 or m.shape[0] != B
            or m.shape[1] not in (1, Tq) or m.shape[2] not in (1, Tk)):
        # TODO(synk): unusual mask shapes fall back to a dense [B,Tq,Tk] broadcast.
        m = jnp.broadcast_to(m, (B, Tq, Tk))
    return m


def _bcast_spec(shape, Tq, tq, Tk, tk):
    """BlockSpec for a [B, mq, mk] (possibly un-broadcast) mask tensor.

    tk=None -> 2-D grid (B, nq); otherwise 3-D grid (B, nq, nk)."""
    _, mq, mk = shape
    q_tiled = mq == Tq
    k_tiled = tk is not None and mk == Tk
    bq = tq if q_tiled else 1
    bk = tk if k_tiled else mk

    if tk is None:
        def idx(b, qi, _q=q_tiled):
            return (b, qi if _q else 0, 0)
    else:
        def idx(b, qi, ki, _q=q_tiled, _k=k_tiled):
            return (b, qi if _q else 0, ki if _k else 0)

    return pl.BlockSpec((1, bq, bk), idx)


# ---------------------------------------------------------------------------
# Kernels
# ---------------------------------------------------------------------------

def _mha_full_kernel(*refs, inv_scale, has_mask, has_qmask):
    """Full-Tk kernel used when the (B, Tq, Tk) attention matrix is returned."""
    it = iter(refs)
    q_ref = next(it)                               # (1, tq, D)
    k_ref = next(it)                               # (1, Tk, D)
    v_ref = next(it)                               # (1, Tk, D)
    mask_ref = next(it) if has_mask else None      # (1, tq|1, Tk|1) int8
    qmask_ref = next(it) if has_qmask else None    # (1, tq|1, Tk|1) float
    out_ref = next(it)                             # (1, tq, D)
    attn_ref = next(it)                            # (1, tq, Tk)

    # Fold 1/sqrt(num_hidden) into the small (tq, D) q tile.
    q = q_ref[0] * inv_scale
    k = k_ref[0]
    v = v_ref[0]

    # scores = Q @ K^T: contract the last dims directly (no XLU transpose).
    scores = lax.dot_general(q, k, (((1,), (1,)), ((), ())),
                             preferred_element_type=jnp.float32)     # (tq, Tk) f32
    if has_mask:
        scores = jnp.where(mask_ref[0] != 0, NEG_FILL, scores)       # masked_fill

    # Numerically stable softmax over the key axis.
    m = jnp.max(scores, axis=-1, keepdims=True)
    e = jnp.exp(scores - m)
    s = jnp.sum(e, axis=-1, keepdims=True)
    inv = pl.reciprocal(s, approx=True)            # EUP
    inv = inv * (2.0 - s * inv)                    # one Newton step -> ~f32 exact
    p = e * inv                                    # (tq, Tk) f32

    if has_qmask:
        p = p * qmask_ref[0].astype(jnp.float32)   # post-softmax query_mask

    attn_ref[0] = p.astype(attn_ref.dtype)
    out_ref[0] = lax.dot_general(p.astype(v.dtype), v, (((1,), (0,)), ((), ())),
                                 preferred_element_type=jnp.float32
                                 ).astype(out_ref.dtype)


def _mha_flash_kernel(*refs, inv_scale, has_mask, has_qmask, qmask_on_out):
    """Tk-tiled online-softmax kernel (return_attn=False path)."""
    it = iter(refs)
    q_ref = next(it)                               # (1, tq, D)
    k_ref = next(it)                               # (1, tk, D)
    v_ref = next(it)                               # (1, tk, D)
    mask_ref = next(it) if has_mask else None      # (1, tq|1, tk|1) int8
    qmask_ref = next(it) if has_qmask else None    # (1, tq|1, tk|1) float
    out_ref = next(it)                             # (1, tq, D)
    m_sc = next(it)                                # (tq, 1)  f32 running max
    l_sc = next(it)                                # (tq, 1)  f32 running sum
    acc_sc = next(it)                              # (tq, D)  f32 running PV

    ki = pl.program_id(2)

    @pl.when(ki == 0)
    def _init():
        m_sc[...] = jnp.full(m_sc.shape, -jnp.inf, dtype=m_sc.dtype)
        l_sc[...] = jnp.zeros(l_sc.shape, dtype=l_sc.dtype)
        acc_sc[...] = jnp.zeros(acc_sc.shape, dtype=acc_sc.dtype)

    q = q_ref[0] * inv_scale
    k = k_ref[0]
    v = v_ref[0]

    s = lax.dot_general(q, k, (((1,), (1,)), ((), ())),
                        preferred_element_type=jnp.float32)          # (tq, tk) f32
    if has_mask:
        s = jnp.where(mask_ref[0] != 0, NEG_FILL, s)                 # masked_fill

    m_prev = m_sc[...]
    m_new = jnp.maximum(m_prev, jnp.max(s, axis=-1, keepdims=True))
    alpha = jnp.exp(m_prev - m_new)
    p = jnp.exp(s - m_new)
    # Softmax denominator uses the UN-masked probabilities (query_mask is
    # applied post-softmax in the module, so it must not touch the sum).
    l_sc[...] = alpha * l_sc[...] + jnp.sum(p, axis=-1, keepdims=True)
    if has_qmask and not qmask_on_out:
        p = p * qmask_ref[0].astype(jnp.float32)   # dense query_mask on the PV path
    acc_sc[...] = alpha * acc_sc[...] + lax.dot_general(
        p.astype(v.dtype), v, (((1,), (0,)), ((), ())),
        preferred_element_type=jnp.float32)
    m_sc[...] = m_new

    @pl.when(ki == pl.num_programs(2) - 1)
    def _finalize():
        l = l_sc[...]
        inv = pl.reciprocal(l, approx=True)
        inv = inv * (2.0 - l * inv)
        o = acc_sc[...] * inv
        if has_qmask and qmask_on_out:
            # Per-query mask commutes with the V contraction: apply to the
            # (tq, D) output instead of every (tq, tk) probability tile.
            o = o * qmask_ref[0].astype(jnp.float32)
        out_ref[0] = o.astype(out_ref.dtype)


# ---------------------------------------------------------------------------
# Wrapper
# ---------------------------------------------------------------------------

def multihead_attention(key, value, query, num_hidden,
                        mask=None, query_mask=None, return_attn=True,
                        q_block=None, k_block=None):
    """Pallas implementation of MultiHead.forward(key, value, query, mask, query_mask).

    Returns (result, attn).  With return_attn=False a flash-style (Tk-tiled,
    online-softmax) kernel is used and attn is None.
    """
    B, Tk, D = key.shape
    Tq = query.shape[1]
    inv_scale = 1.0 / (float(num_hidden) ** 0.5)
    vmem_limit = _vmem_limit_bytes()
    budget = vmem_limit - 4 * 1024 * 1024          # headroom for Mosaic scratch

    mask_arr = None
    if mask is not None:
        # int8 0/1 mask (4x fewer HBM bytes than f32).  '!= 0' is taken BEFORE
        # the narrowing cast so float masks keep exact masked_fill semantics.
        mask_arr = jnp.not_equal(
            _normalize_mask3d(mask, B, Tq, Tk, prefer="k"), 0).astype(jnp.int8)

    qmask_arr = None
    if query_mask is not None:
        qmask_arr = _normalize_mask3d(query_mask, B, Tq, Tk, prefer="q")
        if not jnp.issubdtype(qmask_arr.dtype, jnp.floating):
            qmask_arr = qmask_arr.astype(jnp.float32)

    flops = 4 * B * Tq * Tk * D
    transcendentals = B * Tq * Tk

    if return_attn:
        tq = q_block or _pick_tq_full(Tq, Tk, D, query.dtype, key.dtype,
                                      query.dtype, query.dtype,
                                      mask_arr, qmask_arr, budget)
        assert Tq % tq == 0
        nq = Tq // tq

        in_specs = [
            pl.BlockSpec((1, tq, D), lambda b, qi: (b, qi, 0)),   # q tile
            pl.BlockSpec((1, Tk, D), lambda b, qi: (b, 0, 0)),    # K (const over qi)
            pl.BlockSpec((1, Tk, D), lambda b, qi: (b, 0, 0)),    # V (const over qi)
        ]
        inputs = [query, key, value]
        if mask_arr is not None:
            in_specs.append(_bcast_spec(mask_arr.shape, Tq, tq, Tk, None))
            inputs.append(mask_arr)
        if qmask_arr is not None:
            in_specs.append(_bcast_spec(qmask_arr.shape, Tq, tq, Tk, None))
            inputs.append(qmask_arr)

        bytes_accessed = sum(int(x.size) * x.dtype.itemsize for x in inputs)
        bytes_accessed += B * Tq * D * query.dtype.itemsize       # result
        bytes_accessed += B * Tq * Tk * query.dtype.itemsize      # attn

        kernel = partial(_mha_full_kernel, inv_scale=inv_scale,
                         has_mask=mask_arr is not None,
                         has_qmask=qmask_arr is not None)

        result, attn = pl.pallas_call(
            kernel,
            out_shape=(jax.ShapeDtypeStruct((B, Tq, D), query.dtype),
                       jax.ShapeDtypeStruct((B, Tq, Tk), query.dtype)),
            grid=(B, nq),
            in_specs=in_specs,
            out_specs=(pl.BlockSpec((1, tq, D), lambda b, qi: (b, qi, 0)),
                       pl.BlockSpec((1, tq, Tk), lambda b, qi: (b, qi, 0))),
            compiler_params=pltpu.CompilerParams(
                dimension_semantics=("parallel", "parallel"),
                vmem_limit_bytes=vmem_limit),
            cost_estimate=pl.CostEstimate(flops=flops,
                                          transcendentals=transcendentals,
                                          bytes_accessed=bytes_accessed),
        )(*inputs)
        return result, attn

    # ----- return_attn=False: flash-style kernel, Tk tiled on the grid -----
    tq_auto, tk_auto = _pick_tiles_flash(Tq, Tk, D, query.dtype, key.dtype,
                                         query.dtype, mask_arr, qmask_arr, budget)
    tq = q_block or tq_auto
    tk = k_block or tk_auto
    assert Tq % tq == 0 and Tk % tk == 0
    nq, nk = Tq // tq, Tk // tk
    qmask_on_out = qmask_arr is not None and qmask_arr.shape[2] == 1

    in_specs = [
        pl.BlockSpec((1, tq, D), lambda b, qi, ki: (b, qi, 0)),
        pl.BlockSpec((1, tk, D), lambda b, qi, ki: (b, ki, 0)),
        pl.BlockSpec((1, tk, D), lambda b, qi, ki: (b, ki, 0)),
    ]
    inputs = [query, key, value]
    if mask_arr is not None:
        in_specs.append(_bcast_spec(mask_arr.shape, Tq, tq, Tk, tk))
        inputs.append(mask_arr)
    if qmask_arr is not None:
        in_specs.append(_bcast_spec(qmask_arr.shape, Tq, tq, Tk, tk))
        inputs.append(qmask_arr)

    bytes_accessed = int(query.size) * query.dtype.itemsize
    bytes_accessed += nq * (int(key.size) * key.dtype.itemsize
                            + int(value.size) * value.dtype.itemsize)
    if mask_arr is not None:
        bytes_accessed += int(mask_arr.size) * mask_arr.dtype.itemsize
    if qmask_arr is not None:
        bytes_accessed += int(qmask_arr.size) * qmask_arr.dtype.itemsize
    bytes_accessed += B * Tq * D * query.dtype.itemsize

    kernel = partial(_mha_flash_kernel, inv_scale=inv_scale,
                     has_mask=mask_arr is not None,
                     has_qmask=qmask_arr is not None,
                     qmask_on_out=qmask_on_out)

    result = pl.pallas_call(
        kernel,
        out_shape=jax.ShapeDtypeStruct((B, Tq, D), query.dtype),
        grid=(B, nq, nk),
        in_specs=in_specs,
        out_specs=pl.BlockSpec((1, tq, D), lambda b, qi, ki: (b, qi, 0)),
        scratch_shapes=[pltpu.VMEM((tq, 1), jnp.float32),
                        pltpu.VMEM((tq, 1), jnp.float32),
                        pltpu.VMEM((tq, D), jnp.float32)],
        compiler_params=pltpu.CompilerParams(
            dimension_semantics=("parallel", "parallel", "arbitrary"),
            vmem_limit_bytes=vmem_limit),
        cost_estimate=pl.CostEstimate(flops=flops,
                                      transcendentals=transcendentals,
                                      bytes_accessed=bytes_accessed),
    )(*inputs)
    return result, None


# ---------------------------------------------------------------------------
# Reference + test
# ---------------------------------------------------------------------------

def _reference(key, value, query, num_hidden, mask=None, query_mask=None):
    hp = lax.Precision.HIGHEST
    attn = jnp.einsum("bqd,bkd->bqk", query, key, precision=hp)
    attn = attn / (float(num_hidden) ** 0.5)
    if mask is not None:
        attn = jnp.where(jnp.asarray(mask) != 0, NEG_FILL, attn)
    attn = jax.nn.softmax(attn, axis=-1)
    if query_mask is not None:
        attn = attn * query_mask
    return jnp.einsum("bqk,bkd->bqd", attn, value, precision=hp), attn


if __name__ == "__main__":
    B, Tq, Tk, D = 2, 128, 384, 128   # lane-dense D; Tk a multiple of 128
    num_hidden = D

    k0, k1, k2, k3, k4 = jax.random.split(jax.random.PRNGKey(0), 5)
    key = jax.random.normal(k0, (B, Tk, D), jnp.float32)
    value = jax.random.normal(k1, (B, Tk, D), jnp.float32)
    query = jax.random.normal(k2, (B, Tq, D), jnp.float32)

    mask = jax.random.bernoulli(k3, 0.25, (B, Tq, Tk))                    # dense bool
    key_mask = jax.random.bernoulli(k3, 0.20, (B, 1, Tk))                 # per-key
    qmask_col = jax.random.bernoulli(k4, 0.8, (B, Tq, 1)).astype(jnp.float32)
    qmask_dense = jnp.broadcast_to(qmask_col, (B, Tq, Tk))

    # Tolerance accounts for the MXU's default (non-HIGHEST) matmul precision.
    def check(name, got, want, atol=5e-3, rtol=5e-3):
        assert got.shape == want.shape, f"{name}: shape {got.shape} vs {want.shape}"
        assert jnp.allclose(got, want, atol=atol, rtol=rtol), f"{name} mismatch"

    # 1) full kernel, no masks
    res, attn = multihead_attention(key, value, query, num_hidden)
    jax.block_until_ready((res, attn))
    ref_res, ref_attn = _reference(key, value, query, num_hidden)
    check("result(no mask)", res, ref_res)
    check("attn(no mask)", attn, ref_attn)

    # 2) full kernel, dense mask + per-query query_mask, forced q tiling (nq=2)
    res_m, attn_m = multihead_attention(key, value, query, num_hidden,
                                        mask=mask, query_mask=qmask_col,
                                        q_block=64)
    jax.block_until_ready((res_m, attn_m))
    ref_res_m, ref_attn_m = _reference(key, value, query, num_hidden,
                                       mask=mask, query_mask=qmask_col)
    check("result(masked)", res_m, ref_res_m)
    check("attn(masked)", attn_m, ref_attn_m)

    # 3) flash kernel (return_attn=False), no masks  (nk = 3 online-softmax steps)
    res_f, attn_none = multihead_attention(key, value, query, num_hidden,
                                           return_attn=False)
    res_f = jax.block_until_ready(res_f)
    assert attn_none is None
    check("result(flash)", res_f, ref_res)

    # 4) flash kernel, dense mask + per-query query_mask (applied on the output)
    res_fm, _ = multihead_attention(key, value, query, num_hidden,
                                    mask=mask, query_mask=qmask_col,
                                    return_attn=False, q_block=64, k_block=128)
    res_fm = jax.block_until_ready(res_fm)
    check("result(flash, masked)", res_fm, ref_res_m)

    # 5) flash kernel, broadcast key mask + dense query_mask (applied on p)
    res_fk, _ = multihead_attention(key, value, query, num_hidden,
                                    mask=key_mask, query_mask=qmask_dense,
                                    return_attn=False)
    res_fk = jax.block_until_ready(res_fk)
    ref_res_fk, _ = _reference(key, value, query, num_hidden,
                               mask=key_mask, query_mask=qmask_dense)
    check("result(flash, key mask)", res_fk, ref_res_fk)

    print("KERNEL_OK")
</pallas_src>

<mosaic_0001>
module attributes {stable_mosaic.version = 11 : i64} {
  func.func @_mha_full_kernel(%arg0: i32, %arg1: i32, %arg2: memref<1x128x128xf32, #tpu.memory_space<vmem>>, %arg3: memref<1x384x128xf32, #tpu.memory_space<vmem>>, %arg4: memref<1x384x128xf32, #tpu.memory_space<vmem>>, %arg5: memref<1x128x128xf32, #tpu.memory_space<vmem>>, %arg6: memref<1x128x384xf32, #tpu.memory_space<vmem>>) attributes {dimension_semantics = [#tpu.dimension_semantics<parallel>, #tpu.dimension_semantics<parallel>], iteration_bounds = array<i64: 2, 1>, scalar_prefetch = 0 : i64, scratch_operands = 0 : i64, tpu.core_type = #tpu.core_type<tc>, window_params = [{transform_indices = @transform_0, window_bounds = array<i64: 1, 128, 128>}, {transform_indices = @transform_1, window_bounds = array<i64: 1, 384, 128>}, {transform_indices = @transform_2, window_bounds = array<i64: 1, 384, 128>}, {transform_indices = @transform_3, window_bounds = array<i64: 1, 128, 128>}, {transform_indices = @transform_4, window_bounds = array<i64: 1, 128, 384>}]} {
    %c0 = arith.constant 0 : index
    %c0_0 = arith.constant 0 : index
    %c0_1 = arith.constant 0 : index
    %0 = vector.load %arg2[%c0, %c0_0, %c0_1] : memref<1x128x128xf32, #tpu.memory_space<vmem>>, vector<1x128x128xf32>
    %1 = vector.shape_cast %0 : vector<1x128x128xf32> to vector<128x128xf32>
    %cst = arith.constant 0.0883883461 : f32
    %2 = vector.broadcast %cst : f32 to vector<128x128xf32>
    %3 = arith.mulf %1, %2 : vector<128x128xf32>
    %c0_2 = arith.constant 0 : index
    %c0_3 = arith.constant 0 : index
    %c0_4 = arith.constant 0 : index
    %4 = vector.load %arg3[%c0_2, %c0_3, %c0_4] : memref<1x384x128xf32, #tpu.memory_space<vmem>>, vector<1x384x128xf32>
    %5 = vector.shape_cast %4 : vector<1x384x128xf32> to vector<384x128xf32>
    %c0_5 = arith.constant 0 : index
    %c0_6 = arith.constant 0 : index
    %c0_7 = arith.constant 0 : index
    %6 = vector.load %arg4[%c0_5, %c0_6, %c0_7] : memref<1x384x128xf32, #tpu.memory_space<vmem>>, vector<1x384x128xf32>
    %7 = vector.shape_cast %6 : vector<1x384x128xf32> to vector<384x128xf32>
    %cst_8 = arith.constant dense<0.000000e+00> : vector<128x384xf32>
    %8 = tpu.matmul %3, %5, %cst_8 {dimension_numbers = #tpu.dot_dimension_numbers<[1], [1], [0], [0], [0, 0, 1, 0], [], []>} : vector<128x128xf32>, vector<384x128xf32>, vector<128x384xf32> -> vector<128x384xf32>
    %cst_9 = arith.constant dense<0xFF800000> : vector<128xf32>
    %9 = vector.multi_reduction <maximumf>, %8, %cst_9 [1] : vector<128x384xf32> to vector<128xf32>
    %10 = vector.shape_cast %9 : vector<128xf32> to vector<128x1xf32>
    %11 = vector.broadcast %10 : vector<128x1xf32> to vector<128x384xf32>
    %12 = arith.subf %8, %11 : vector<128x384xf32>
    %13 = math.exp %12 : vector<128x384xf32>
    %cst_10 = arith.constant dense<0.000000e+00> : vector<128xf32>
    %14 = vector.multi_reduction <add>, %13, %cst_10 [1] : vector<128x384xf32> to vector<128xf32>
    %15 = vector.shape_cast %14 : vector<128xf32> to vector<128x1xf32>
    %16 = tpu.reciprocal %15 {approx = true} : vector<128x1xf32> -> vector<128x1xf32>
    %17 = arith.mulf %15, %16 : vector<128x1xf32>
    %cst_11 = arith.constant 2.000000e+00 : f32
    %18 = vector.broadcast %cst_11 : f32 to vector<128x1xf32>
    %19 = arith.subf %18, %17 : vector<128x1xf32>
    %20 = arith.mulf %16, %19 : vector<128x1xf32>
    %21 = vector.broadcast %20 : vector<128x1xf32> to vector<128x384xf32>
    %22 = arith.mulf %13, %21 : vector<128x384xf32>
    %c0_12 = arith.constant 0 : index
    %c0_13 = arith.constant 0 : index
    %c0_14 = arith.constant 0 : index
    %23 = vector.load %arg6[%c0_12, %c0_13, %c0_14] : memref<1x128x384xf32, #tpu.memory_space<vmem>>, vector<1x128x384xf32>
    %24 = vector.shape_cast %23 : vector<1x128x384xf32> to vector<128x384xf32>
    %25 = vector.shape_cast %22 : vector<128x384xf32> to vector<1x128x384xf32>
    tpu.vector_store %arg6[%c0_12, %c0_13, %c0_14], %25 {strides = array<i32>} : memref<1x128x384xf32, #tpu.memory_space<vmem>>, vector<1x128x384xf32>,
    %cst_15 = arith.constant dense<0.000000e+00> : vector<128x128xf32>
    %26 = tpu.matmul %22, %7, %cst_15 {dimension_numbers = #tpu.dot_dimension_numbers<[1], [0], [0], [1], [0, 0, 1, 1], [], []>} : vector<128x384xf32>, vector<384x128xf32>, vector<128x128xf32> -> vector<128x128xf32>
    %c0_16 = arith.constant 0 : index
    %c0_17 = arith.constant 0 : index
    %c0_18 = arith.constant 0 : index
    %27 = vector.load %arg5[%c0_16, %c0_17, %c0_18] : memref<1x128x128xf32, #tpu.memory_space<vmem>>, vector<1x128x128xf32>
    %28 = vector.shape_cast %27 : vector<1x128x128xf32> to vector<128x128xf32>
    %29 = vector.shape_cast %26 : vector<128x128xf32> to vector<1x128x128xf32>
    tpu.vector_store %arg5[%c0_16, %c0_17, %c0_18], %29 {strides = array<i32>} : memref<1x128x128xf32, #tpu.memory_space<vmem>>, vector<1x128x128xf32>,
    return
  }
  func.func @transform_0(%arg0: i32, %arg1: i32) -> (i32, i32, i32) {
    %c0_i32 = arith.constant 0 : i32
    %c0_i32_0 = arith.constant 0 : i32
    return %arg0, %arg1, %c0_i32 : i32, i32, i32
  }
  func.func @transform_1(%arg0: i32, %arg1: i32) -> (i32, i32, i32) {
    %c0_i32 = arith.constant 0 : i32
    %c0_i32_0 = arith.constant 0 : i32
    %c0_i32_1 = arith.constant 0 : i32
    return %arg0, %c0_i32, %c0_i32_0 : i32, i32, i32
  }
  func.func @transform_2(%arg0: i32, %arg1: i32) -> (i32, i32, i32) {
    %c0_i32 = arith.constant 0 : i32
    %c0_i32_0 = arith.constant 0 : i32
    %c0_i32_1 = arith.constant 0 : i32
    return %arg0, %c0_i32, %c0_i32_0 : i32, i32, i32
  }
  func.func @transform_3(%arg0: i32, %arg1: i32) -> (i32, i32, i32) {
    %c0_i32 = arith.constant 0 : i32
    %c0_i32_0 = arith.constant 0 : i32
    return %arg0, %arg1, %c0_i32 : i32, i32, i32
  }
  func.func @transform_4(%arg0: i32, %arg1: i32) -> (i32, i32, i32) {
    %c0_i32 = arith.constant 0 : i32
    %c0_i32_0 = arith.constant 0 : i32
    return %arg0, %arg1, %c0_i32 : i32, i32, i32
  }
}

</mosaic_0001>

<bundles_post_ra>
// kernel: tpu_custom_call.1
= control target key start
LH: loop header
LB: loop body
LE: loop exit
PB: predicated region body
PF: predicated region fallthrough
CT: control target
= control target key end

     0   :  { %s3328_s0 = inlined_call_operand.hbm [shape: f32[2,128,128], index: 0, kind: input, shape index: {}]   ;;  %s3329_s1 = inlined_call_operand.hbm [shape: f32[2,384,128], index: 1, kind: input, shape index: {}]   ;;  %s3330_s2 = inlined_call_operand.hbm [shape: f32[2,384,128], index: 2, kind: input, shape index: {}]   ;;  %s3331_s3 = inlined_call_operand.hbm [shape: f32[2,128,128], index: 3, kind: output, shape index: {0}]   ;;  %s3332_s4 = inlined_call_operand.hbm [shape: f32[2,128,384], index: 4, kind: output, shape index: {1}]  }
   0x1   :  { %3344 = sst [smem:[#allocation20_spill]] %s3329_s1 }
   0x2   :  { %10 = vsyncpa [#allocation3], 0 }
   0x3   :  { %12 = vsyncpa [#allocation3 + $0x1], 0 }
   0x4   :  { %13 = vsyncpa [#allocation6], 0 }
   0x5   :  { %15 = vsyncpa [#allocation6 + $0x1], 0 }
   0x6   :  { %16 = vsyncpa [#allocation4], 0 }
   0x7   :  { %18 = vsyncpa [#allocation4 + $0x1], 0 }
   0x8   :  { %19 = vsyncpa [#allocation10], 0 }
   0x9   :  { %21 = vsyncpa [#allocation10 + $0x1], 0  ;;  %s2497_s15 = smov 0   ;;  %s2499_s16 = smov 0  }
   0xa   :  { %s2501_s17 = smov 0   ;;  %s2503_s18 = smov 0  }
   0xb   :  { %s2505_s19 = smov 0   ;;  %s2507_s20 = smov 0  }
   0xc LB: > { %3345 = sst [smem:[#allocation15_spill]] %s2447_s17  ;;  %s2528_s21 = sadd.s32 4294967295, %s2459_s20   ;;  %s2459_s20 = sphi %s2507_s20, %s27_s20   ;;  %s2455_s19 = sphi %s2505_s19, %s3370_s19   ;;  %s2451_s18 = sphi %s2503_s18, %s3369_s18   ;;  %s2447_s17 = sphi %s2501_s17, %s3365_s17   ;;  %s2443_s16 = sphi %s2499_s16, %s3368_s16   ;;  %s2439_s15 = sphi %s2497_s15, %s3367_s15  }
   0xd   : > { %3346 = sst [smem:[#allocation16_spill]] %s2459_s20  ;;  %s1705_s22 = sadd.s32 4294967294, %s2459_s20  }
   0xe   : > { %s39_s23 = sadd.s32 1, %s2455_s19  ;;  %s48_s24 = sadd.s32 1, %s2447_s17 }
   0xf   : > { %p41_p0 = scmp.ge.s32.totalorder %s39_s23, 2  ;;  %p55_p1 = scmp.ne.s32.totalorder %s2447_s17, %s2443_s16 }
  0x10   : > { %p56_p2 = scmp.eq.s32.totalorder %s2459_s20, 0  ;;  %p61_p3 = scmp.ne.s32.totalorder %s2443_s16, %s2439_s15 }
  0x11   : > { %s3372_s23 = smov (%p41_p0, %s39_s23), 0  ;;  %p62_p5 = scmp.eq.s32.totalorder %s2528_s21, 0 }
  0x12   : > { %3347 = sst [smem:[#allocation17_spill]] %s3372_s23  ;;  %p2540_p4 = por %p56_p2, %p55_p1 }
  0x13   : > { %s43_s26 = ssub.s32 %s2455_s19, %s3372_s23  ;;  %p139_p6 = scmp.eq.s32.totalorder %s2528_s21, 1 }
  0x14   : > { %p46_p7 = scmp.eq.s32.totalorder %s43_s26, 0  ;;  %p2548_p8 = por %p62_p5, %p61_p3 }
  0x15   : > { %p2552_p9 = por %p139_p6, %p55_p1  ;;  %p145_p10 = scmp.eq.s32.totalorder %s1705_s22, 1 }
  0x16   : > { %s2557_s29 = scalar_select %p46_p7, %s2447_s17, %s48_s24  }
  0x17   : > { %p2559_p11 = por %p145_p10, %p61_p3  ;;  %p2077_p13 = scmp.lt.s32.totalorder %s2459_s20, 2 }
  0x18   : > { %3351 = sst [smem:[#allocation18_spill]] %s2557_s29  ;;  %s2566_s5 = sand.u32 1, %s2447_s17  }
  0x19   : > { %p2570_p0 = pnand %p2077_p13, %p2540_p4  ;;  %s216_s7 = sand.u32 1, %s2459_s20  }
  0x1a   : > { %s3333_s8 = smul.u32 384, %s2566_s5  ;;  %p1713_p1 = scmp.ge.s32.totalorder %s2459_s20, 1 }
  0x1b   : > { %s3334_s9 = smul.u32 6144, %s2455_s19  ;;  %s3354_s1 = sld [smem:[#allocation20_spill]] }
  0x1c   : > { %s220_s13 = scalar_lea.vmem [#allocation5], %s3333_s8  ;;  %p256_p2 = scmp.lt.s32.totalorder %s2459_s20, 3 }
  0x1d   : > { %s227_s14 = sshll.u32 %s220_s13, 4  ;;  %s2586_s22 = scalar_lea.sflag [#allocation6], %s216_s7  ;;  %s228_s14 = int_to_ptr.vmem [resolvable:$true] %s227_s14 }
  0x1e   : > { %p2263_p3 = pneg %p2570_p0  ;;  %s2274_s24 = scalar_lea.vmem %s228_s14, 6144 }
  0x1f   : > { %p2275_p4 = scmp.ne.s32.totalorder %s228_s14, %s2274_s24  ;;  %s2461_s25 = smov [#allocation5]  }
  0x20   : > { %s2279_s26 = sshll.u32 %s2461_s25, 4  ;;  %s2280_s26 = int_to_ptr.vmem [resolvable:$false] %s2279_s26 }
  0x21   : > { %s226_s12 = scalar_lea.hbm %s3354_s1, %s3334_s9  ;;  %p2277_p5 = pnand %p2275_p4, %p2263_p3 }
  0x22   : > { %s2281_s10 = scalar_lea.vmem %s2280_s26, 12288  ;;  %p2282_p7 = scmp.lt.s32.totalorder %s228_s14, %s2280_s26 }
  0x23   : > { %p2278_p6 = pneg %p2277_p5  ;;  %p2283_p10 = scmp.lt.s32.totalorder %s2281_s10, %s2274_s24 }
  0x25   : > { %p2284_p13 = por %p2283_p10, %p2282_p7 }
  0x27   : > { %p2285_p12 = pnand %p2284_p13, %p2278_p6 }
  0x29   : > { %2288 = shalt.err (!%p2285_p12)
}
  0x2a   : > { %s3337_s11 = smov 128   ;;  %s3339_s7 = smov 8  }
  0x2b   : > { %2066 = dma.hbm_to_vmem [thread:$0]  (!%p2570_p0), %s226_s12, 6144, %s228_s14, %s2586_s22, %s3337_s11, %s3337_s11, %s3339_s7  }
  0x2c   : > { %p2603_p4 = pnand %p1713_p1, %p256_p2  ;;  %s1708_s24 = sshll.u32 %s2566_s5, 7 }
  0x2d   : > { %s1722_s25 = sshll.u32 %s2455_s19, 11  ;;  %s197_s9 = scalar_lea.vmem [#allocation2], %s1708_s24 }
  0x2e   : > { %s205_s8 = scalar_lea.hbm %s3328_s0, %s1722_s25  ;;  %s206_s1 = sshll.u32 %s197_s9, 4  ;;  %s207_s1 = int_to_ptr.vmem [resolvable:$true] %s206_s1 }
  0x2f   : > { %s3356_s23 = smul.u32 6144, %s2455_s19  ;;  %s194_s14 = scalar_lea.sflag [#allocation3], %s2566_s5 }
  0x30   : > { %s2302_s11 = scalar_lea.vmem %s207_s1, 2048  ;;  %s2464_s7 = smov [#allocation2]  }
  0x31   : > { %s2617_s12 = scalar_lea.hbm %s3330_s2, %s3356_s23  ;;  %p2303_p12 = scmp.ne.s32.totalorder %s207_s1, %s2302_s11 }
  0x32   : > { %s2307_s20 = sshll.u32 %s2464_s7, 4  ;;  %s2308_s20 = int_to_ptr.vmem [resolvable:$false] %s2307_s20 }
  0x33   : > { %p2305_p1 = pnand %p2303_p12, %p2263_p3  ;;  %s2309_s25 = scalar_lea.vmem %s2308_s20, 4096 }
  0x34   : > { %p2310_p5 = scmp.lt.s32.totalorder %s207_s1, %s2308_s20  ;;  %p2311_p6 = scmp.lt.s32.totalorder %s2309_s25, %s2302_s11 }
  0x35   : > { %p2306_p2 = pneg %p2305_p1 }
  0x36   : > { %p2312_p7 = por %p2311_p6, %p2310_p5 }
  0x38   : > { %p2313_p10 = pnand %p2312_p7, %p2306_p2 }
  0x3a   : > { %2316 = shalt.err (!%p2313_p10)
}
  0x3b   : > { %s3357_s17 = smov 8   ;;  %s3358_s23 = smov 128  }
  0x3c   : > { %2063 = dma.hbm_to_vmem [thread:$0]  (!%p2570_p0), %s205_s8, 2048, %s207_s1, %s194_s14, %s3358_s23, %s3358_s23, %s3357_s17  }
  0x3d   : > { %s3359_s29 = smul.u32 384, %s2566_s5  ;;  %s2465_s20 = smov [#allocation7]  }
  0x3e   : > { %s2335_s11 = sshll.u32 %s2465_s20, 4  ;;  %s2336_s11 = int_to_ptr.vmem [resolvable:$false] %s2335_s11 }
  0x3f   : > { %s241_s9 = scalar_lea.vmem [#allocation7], %s3359_s29  ;;  %s2337_s26 = scalar_lea.vmem %s2336_s11, 12288 }
  0x40   : > { %s248_s24 = sshll.u32 %s241_s9, 4  ;;  %s249_s24 = int_to_ptr.vmem [resolvable:$true] %s248_s24 }
  0x41   : > { %s2330_s7 = scalar_lea.vmem %s249_s24, 6144  ;;  %p2338_p2 = scmp.lt.s32.totalorder %s249_s24, %s2336_s11 }
  0x42   : > { %p2331_p13 = scmp.ne.s32.totalorder %s249_s24, %s2330_s7  ;;  %p2339_p5 = scmp.lt.s32.totalorder %s2337_s26, %s2330_s7 }
  0x44   : > { %p2333_p12 = pnand %p2331_p13, %p2263_p3  ;;  %p2340_p6 = por %p2339_p5, %p2338_p2 }
  0x46   : > { %p2334_p1 = pneg %p2333_p12 }
  0x48   : > { %p2341_p7 = pnand %p2340_p6, %p2334_p1 }
  0x4a   : > { %2344 = shalt.err (!%p2341_p7)
}
  0x4b   : > { %2069 = dma.hbm_to_vmem [thread:$0]  (!%p2570_p0), %s2617_s12, 6144, %s249_s24, %s2586_s22, %s3358_s23, %s3358_s23, %s3357_s17  }
  0x4c   : > { %260 = sbr.rel (%p2603_p4) target bundleno = 949 (0x3b5), region = 32 }
  0x51   : > { %s2643_s1 = sand.u32 1, %s2443_s16  }
  0x52   : > { %s1714_s5 = sshll.u32 %s2643_s1, 7  ;;  %s263_s8 = scalar_lea.sflag [#allocation3], %s2643_s1 }
  0x53   : > { %s2649_s6 = scalar_lea.vmem [#allocation2], %s1714_s5 }
  0x54   : > { %2422 = dma.done.wait (%p2548_p8), %s263_s8, 2048  }
  0x55   : > { %2424 = vsyncadd (%p2548_p8), %s263_s8, 4294965248  ;;  %s271_s22 = sand.u32 1, %s2528_s21   ;;  %s2657_s13 = smul.u32 384, %s2643_s1 }
  0x56   : > { %s272_s10 = scalar_lea.sflag [#allocation6], %s271_s22 }
  0x57   : > { %s2660_s12 = scalar_lea.vmem [#allocation5], %s2657_s13 }
  0x58   : > { %2426 = dma.done.wait (%p2548_p8), %s272_s10, 12288  }
  0x59   : > { %2428 = vsyncadd (%p2548_p8), %s272_s10, 4294955008  ;;  %v390_v0 = vld [vmem:[%s2660_s12 + $0xf8] sm:$0xff]  ;;  %v389_v3 = vld [vmem:[%s2660_s12 + $0xf0] sm:$0xff]  ;;  %s2880_s21 = scalar_lea.vmem [#allocation7], %s2657_s13  ;;  %s3126_s27 = scalar_lea.vmem [#allocation9], %s2657_s13 }
  0x5a   : > { %v406_v1 = vld [vmem:[%s2660_s12 + $0x178] sm:$0xff]  ;;  %1724 = vmatprep.subr.mxu0 %v390_v0  ;;  %v405_v4 = vld [vmem:[%s2660_s12 + $0x170] sm:$0xff]  ;;  %v388_v6 = vld [vmem:[%s2660_s12 + $0xe8] sm:$0xff]  ;;  %s2049_s14 = smul.u32 6144, %s2451_s18  ;;  %s1539_s29 = sshll.u32 %s3126_s27, 4  ;;  %s3228_s29 = int_to_ptr.vmem [resolvable:$true] %s1539_s29 }
  0x5b   : > { %v374_v2 = vld [vmem:[%s2660_s12 + $0x78] sm:$0xff]  ;;  %1932 = vmatprep.subr.mxu1 %v406_v1  ;;  %v373_v5 = vld [vmem:[%s2660_s12 + $0x70] sm:$0xff]  ;;  %v404_v7 = vld [vmem:[%s2660_s12 + $0x168] sm:$0xff]  ;;  %s1505_s9 = scalar_lea.sflag [#allocation10], %s2643_s1  ;;  %s2345_s24 = scalar_lea.vmem %s3228_s29, 6144 }
  0x5c   : > { %1725 = vmatpush3.xpose.msra.mxu0 %v374_v2  ;;  %1933 = vmatpush3.xpose.msra.mxu1 %v406_v1  ;;  %v372_v8 = vld [vmem:[%s2660_s12 + $0x68] sm:$0xff]  ;;  %v387_v9 = vld [vmem:[%s2660_s12 + $0xe0] sm:$0xff]  ;;  %v386_v12 = vld [vmem:[%s2660_s12 + $0xd8] sm:$0xff]  ;;  %s3225_s23 = scalar_lea.hbm %s3332_s4, %s2049_s14  ;;  %p2346_p8 = scmp.ne.s32.totalorder %s3228_s29, %s2345_s24 }
  0x5d   : > { %1726 = vmatprep.subr.mxu0 %v389_v3  ;;  %1934 = vmatprep.subr.mxu1 %v405_v4  ;;  %v403_v10 = vld [vmem:[%s2660_s12 + $0x160] sm:$0xff]  ;;  %v402_v13 = vld [vmem:[%s2660_s12 + $0x158] sm:$0xff]  ;;  %v385_v15 = vld [vmem:[%s2660_s12 + $0xd0] sm:$0xff]  ;;  %s2466_s7 = smov [#allocation9]  }
  0x5e   : > { %v371_v11 = vld [vmem:[%s2660_s12 + $0x60] sm:$0xff]  ;;  %v370_v14 = vld [vmem:[%s2660_s12 + $0x58] sm:$0xff]  ;;  %v401_v16 = vld [vmem:[%s2660_s12 + $0x150] sm:$0xff]  ;;  %p2347_p0 = pnand %p2346_p8, %p2552_p9  ;;  %s2349_s20 = sshll.u32 %s2466_s7, 4  ;;  %s2350_s20 = int_to_ptr.vmem [resolvable:$false] %s2349_s20 }
  0x5f   : > { %v327_v17 = vld [vmem:[%s2649_s6] sm:$0xff]  ;;  %v369_v19 = vld [vmem:[%s2660_s12 + $0x50] sm:$0xff]  ;;  %v384_v20 = vld [vmem:[%s2660_s12 + $0xc8] sm:$0xff]  ;;  %s2351_s11 = scalar_lea.vmem %s2350_s20, 12288  ;;  %p2352_p4 = scmp.lt.s32.totalorder %s3228_s29, %s2350_s20 }
  0x60   : > { %1727 = vmatpush3.xpose.msra.mxu0 %v373_v5  ;;  %1935 = vmatpush3.xpose.msra.mxu1 %v405_v4  ;;  %v2684_v18 = vmul.f32 0.088388346, %v327_v17  ;;  %v400_v21 = vld [vmem:[%s2660_s12 + $0x148] sm:$0xff]  ;;  %v383_v23 = vld [vmem:[%s2660_s12 + $0xc0] sm:$0xff]  ;;  %v382_v26 = vld [vmem:[%s2660_s12 + $0xb8] sm:$0xff]  ;;  %p2348_p3 = pneg %p2347_p0  ;;  %p2353_p10 = scmp.lt.s32.totalorder %s2351_s11, %s2345_s24 }
  0x61   : > { %1728 = vmatprep.subr.mxu0 %v388_v6  ;;  %1936 = vmatprep.subr.mxu1 %v404_v7  ;;  %v368_v22 = vld [vmem:[%s2660_s12 + $0x48] sm:$0xff]  ;;  %v399_v24 = vld [vmem:[%s2660_s12 + $0x140] sm:$0xff]  ;;  %v398_v27 = vld [vmem:[%s2660_s12 + $0x138] sm:$0xff] }
  0x62   : > { %1756 = vmatprep.mubr.f32.mxu0 %v2684_v18  ;;  %1964 = vmatprep.mubr.f32.mxu1 %v2684_v18  ;;  %v367_v25 = vld [vmem:[%s2660_s12 + $0x40] sm:$0xff]  ;;  %v366_v28 = vld [vmem:[%s2660_s12 + $0x38] sm:$0xff]  ;;  %v381_v29 = vld [vmem:[%s2660_s12 + $0xb0] sm:$0xff]  ;;  %p2354_p13 = por %p2353_p10, %p2352_p4 }
  0x63   : > { %v397_v30 = vld [vmem:[%s2660_s12 + $0x130] sm:$0xff]  ;;  %v380_v32 = vld [vmem:[%s2660_s12 + $0xa8] sm:$0xff]  ;;  %v379_v35 = vld [vmem:[%s2660_s12 + $0xa0] sm:$0xff] }
  0x64   : > { %1729 = vmatpush3.xpose.msra.mxu0 %v372_v8  ;;  %1937 = vmatpush3.xpose.msra.mxu1 %v404_v7  ;;  %v365_v31 = vld [vmem:[%s2660_s12 + $0x30] sm:$0xff]  ;;  %v396_v33 = vld [vmem:[%s2660_s12 + $0x128] sm:$0xff]  ;;  %v395_v36 = vld [vmem:[%s2660_s12 + $0x120] sm:$0xff]  ;;  %p2355_p12 = pnand %p2354_p13, %p2348_p3 }
  0x65   : > { %1730 = vmatprep.subr.mxu0 %v387_v9  ;;  %1938 = vmatprep.subr.mxu1 %v403_v10  ;;  %v364_v34 = vld [vmem:[%s2660_s12 + $0x28] sm:$0xff]  ;;  %v363_v37 = vld [vmem:[%s2660_s12 + $0x20] sm:$0xff]  ;;  %v378_v38 = vld [vmem:[%s2660_s12 + $0x98] sm:$0xff] }
  0x66   : > { %v394_v39 = vld [vmem:[%s2660_s12 + $0x118] sm:$0xff]  ;;  %v377_v41 = vld [vmem:[%s2660_s12 + $0x90] sm:$0xff]  ;;  %v376_v44 = vld [vmem:[%s2660_s12 + $0x88] sm:$0xff] }
  0x67   : > { %v362_v40 = vld [vmem:[%s2660_s12 + $0x18] sm:$0xff]  ;;  %v393_v42 = vld [vmem:[%s2660_s12 + $0x110] sm:$0xff]  ;;  %v392_v45 = vld [vmem:[%s2660_s12 + $0x108] sm:$0xff] }
  0x68   : > { %1731 = vmatpush3.xpose.msra.mxu0 %v371_v11  ;;  %1939 = vmatpush3.xpose.msra.mxu1 %v403_v10  ;;  %v361_v43 = vld [vmem:[%s2660_s12 + $0x10] sm:$0xff]  ;;  %v360_v46 = vld [vmem:[%s2660_s12 + $0x8] sm:$0xff]  ;;  %v375_v47 = vld [vmem:[%s2660_s12 + $0x80] sm:$0xff] }
  0x69   : > { %1732 = vmatprep.subr.mxu0 %v386_v12  ;;  %1940 = vmatprep.subr.mxu1 %v402_v13  ;;  %v391_v48 = vld [vmem:[%s2660_s12 + $0x100] sm:$0xff]  ;;  %v328_v49 = vld [vmem:[%s2649_s6 + $0x8] sm:$0xff]  ;;  %v329_v51 = vld [vmem:[%s2649_s6 + $0x10] sm:$0xff] }
  0x6a   : > { %v359_v50 = vld [vmem:[%s2660_s12] sm:$0xff]  ;;  %v344_v52 = vmul.f32 0.088388346, %v328_v49  ;;  %v345_v53 = vmul.f32 0.088388346, %v329_v51  ;;  %v330_v54 = vld [vmem:[%s2649_s6 + $0x18] sm:$0xff] }
  0x6b   : > { %v331_v55 = vld [vmem:[%s2649_s6 + $0x20] sm:$0xff]  ;;  %v346_v56 = vmul.f32 0.088388346, %v330_v54  ;;  %v332_v58 = vld [vmem:[%s2649_s6 + $0x28] sm:$0xff]  ;;  %v333_v59 = vld [vmem:[%s2649_s6 + $0x30] sm:$0xff] }
  0x6c   : > { %1733 = vmatpush3.xpose.msra.mxu0 %v370_v14  ;;  %1941 = vmatpush3.xpose.msra.mxu1 %v402_v13  ;;  %v347_v57 = vmul.f32 0.088388346, %v331_v55  ;;  %v348_v60 = vmul.f32 0.088388346, %v332_v58  ;;  %v349_v61 = vmul.f32 0.088388346, %v333_v59 }
  0x6d   : > { %1734 = vmatprep.subr.mxu0 %v385_v15  ;;  %1942 = vmatprep.subr.mxu1 %v401_v16  ;;  %v334_v62 = vld [vmem:[%s2649_s6 + $0x38] sm:$0xff]  ;;  %v335_v63 = vld [vmem:[%s2649_s6 + $0x40] sm:$0xff]  ;;  %v336_v2 = vld [vmem:[%s2649_s6 + $0x48] sm:$0xff] }
  0x6e   : > { %v350_v0 = vmul.f32 0.088388346, %v334_v62  ;;  %v351_v1 = vmul.f32 0.088388346, %v335_v63  ;;  %v337_v3 = vld [vmem:[%s2649_s6 + $0x50] sm:$0xff]  ;;  %v338_v6 = vld [vmem:[%s2649_s6 + $0x58] sm:$0xff] }
  0x6f   : > { %v352_v4 = vmul.f32 0.088388346, %v336_v2  ;;  %v353_v5 = vmul.f32 0.088388346, %v337_v3  ;;  %v339_v7 = vld [vmem:[%s2649_s6 + $0x60] sm:$0xff]  ;;  %v340_v10 = vld [vmem:[%s2649_s6 + $0x68] sm:$0xff] }
  0x70   : > { %1735 = vmatpush3.xpose.msra.mxu0 %v369_v19  ;;  %1943 = vmatpush3.xpose.msra.mxu1 %v401_v16  ;;  %v354_v8 = vmul.f32 0.088388346, %v338_v6  ;;  %v355_v9 = vmul.f32 0.088388346, %v339_v7  ;;  %v341_v11 = vld [vmem:[%s2649_s6 + $0x70] sm:$0xff]  ;;  %v342_v14 = vld [vmem:[%s2649_s6 + $0x78] sm:$0xff] }
  0x71   : > { %1736 = vmatprep.subr.mxu0 %v384_v20  ;;  %1944 = vmatprep.subr.mxu1 %v400_v21  ;;  %v356_v12 = vmul.f32 0.088388346, %v340_v10  ;;  %v357_v13 = vmul.f32 0.088388346, %v341_v11  ;;  %v358_v15 = vmul.f32 0.088388346, %v342_v14 }
  0x74   : > { %1737 = vmatpush3.xpose.msra.mxu0 %v368_v22  ;;  %1945 = vmatpush3.xpose.msra.mxu1 %v400_v21 }
  0x75   : > { %1738 = vmatprep.subr.mxu0 %v383_v23  ;;  %1946 = vmatprep.subr.mxu1 %v399_v24 }
  0x78   : > { %1739 = vmatpush3.xpose.msra.mxu0 %v367_v25  ;;  %1947 = vmatpush3.xpose.msra.mxu1 %v399_v24 }
  0x79   : > { %1740 = vmatprep.subr.mxu0 %v382_v26  ;;  %1948 = vmatprep.subr.mxu1 %v398_v27 }
  0x7c   : > { %1741 = vmatpush3.xpose.msra.mxu0 %v366_v28  ;;  %1949 = vmatpush3.xpose.msra.mxu1 %v398_v27 }
  0x7d   : > { %1742 = vmatprep.subr.mxu0 %v381_v29  ;;  %1950 = vmatprep.subr.mxu1 %v397_v30 }
  0x80   : > { %1743 = vmatpush3.xpose.msra.mxu0 %v365_v31  ;;  %1951 = vmatpush3.xpose.msra.mxu1 %v397_v30 }
  0x81   : > { %1744 = vmatprep.subr.mxu0 %v380_v32  ;;  %1952 = vmatprep.subr.mxu1 %v396_v33 }
  0x84   : > { %1745 = vmatpush3.xpose.msra.mxu0 %v364_v34  ;;  %1953 = vmatpush3.xpose.msra.mxu1 %v396_v33 }
  0x85   : > { %1746 = vmatprep.subr.mxu0 %v379_v35  ;;  %1954 = vmatprep.subr.mxu1 %v395_v36 }
  0x88   : > { %1747 = vmatpush3.xpose.msra.mxu0 %v363_v37  ;;  %1955 = vmatpush3.xpose.msra.mxu1 %v395_v36 }
  0x89   : > { %1748 = vmatprep.subr.mxu0 %v378_v38  ;;  %1956 = vmatprep.subr.mxu1 %v394_v39 }
  0x8c   : > { %1749 = vmatpush3.xpose.msra.mxu0 %v362_v40  ;;  %1957 = vmatpush3.xpose.msra.mxu1 %v394_v39 }
  0x8d   : > { %1750 = vmatprep.subr.mxu0 %v377_v41  ;;  %1958 = vmatprep.subr.mxu1 %v393_v42 }
  0x90   : > { %1751 = vmatpush3.xpose.msra.mxu0 %v361_v43  ;;  %1959 = vmatpush3.xpose.msra.mxu1 %v393_v42 }
  0x91   : > { %1752 = vmatprep.subr.mxu0 %v376_v44  ;;  %1960 = vmatprep.subr.mxu1 %v392_v45 }
  0x94   : > { %1753 = vmatpush3.xpose.msra.mxu0 %v360_v46  ;;  %1961 = vmatpush3.xpose.msra.mxu1 %v392_v45 }
  0x95   : > { %1754 = vmatprep.subr.mxu0 %v375_v47  ;;  %1962 = vmatprep.subr.mxu1 %v391_v48 }
  0x98   : > { %1755 = vmatpush3.xpose.msra.mxu0 %v359_v50  ;;  %1963 = vmatpush3.xpose.msra.mxu1 %v391_v48 }
  0x9b   : > { %1757 = vmatmul.mubr.f32.vlgmr.msra.gmra.mxu0 %v2684_v18  ;;  %1965 = vmatmul.mubr.f32.vlgmr.msra.gmra.mxu1 %v344_v52 }
  0x9c   : > { %1758 = vmatprep.mubr.f32.mxu0 %v344_v52  ;;  %1967 = vmatprep.mubr.f32.mxu1 %v345_v53 }
  0x9f   : > { %1759 = vmatmul.mubr.f32.gmra.mxu0 %v344_v52  ;;  %1968 = vmatmul.mubr.f32.gmra.mxu1 %v346_v56 }
  0xa0   : > { %1760 = vmatprep.mubr.f32.mxu0 %v345_v53  ;;  %1970 = vmatprep.mubr.f32.mxu1 %v347_v57 }
  0xa3   : > { %1761 = vmatmul.mubr.f32.gmra.mxu0 %v345_v53  ;;  %1971 = vmatmul.mubr.f32.gmra.mxu1 %v348_v60 }
  0xa4   : > { %1762 = vmatprep.mubr.f32.mxu0 %v346_v56  ;;  %1973 = vmatprep.mubr.f32.mxu1 %v349_v61 }
  0xa7   : > { %1763 = vmatmul.mubr.f32.gmra.mxu0 %v346_v56  ;;  %1974 = vmatmul.mubr.f32.gmra.mxu1 %v350_v0 }
  0xa8   : > { %1764 = vmatprep.mubr.f32.mxu0 %v347_v57  ;;  %1976 = vmatprep.mubr.f32.mxu1 %v351_v1 }
  0xab   : > { %1765 = vmatmul.mubr.f32.gmra.mxu0 %v347_v57  ;;  %1977 = vmatmul.mubr.f32.gmra.mxu1 %v352_v4 }
  0xac   : > { %1766 = vmatprep.mubr.f32.mxu0 %v348_v60  ;;  %1979 = vmatprep.mubr.f32.mxu1 %v353_v5 }
  0xaf   : > { %1767 = vmatmul.mubr.f32.gmra.mxu0 %v348_v60  ;;  %1980 = vmatmul.mubr.f32.gmra.mxu1 %v354_v8 }
  0xb0   : > { %1768 = vmatprep.mubr.f32.mxu0 %v349_v61  ;;  %1982 = vmatprep.mubr.f32.mxu1 %v355_v9 }
  0xb3   : > { %1769 = vmatmul.mubr.f32.gmra.mxu0 %v349_v61  ;;  %1983 = vmatmul.mubr.f32.gmra.mxu1 %v356_v12 }
  0xb4   : > { %1770 = vmatprep.mubr.f32.mxu0 %v350_v0  ;;  %1985 = vmatprep.mubr.f32.mxu1 %v357_v13 }
  0xb7   : > { %1771 = vmatmul.mubr.f32.gmra.mxu0 %v350_v0  ;;  %1986 = vmatmul.mubr.f32.gmra.mxu1 %v358_v15 }
  0xb8   : > { %1772 = vmatprep.mubr.f32.mxu0 %v351_v1 }
  0xbb   : > { %1773 = vmatmul.mubr.f32.gmra.mxu0 %v351_v1 }
  0xbc   : > { %1774 = vmatprep.mubr.f32.mxu0 %v352_v4 }
  0xbf   : > { %1775 = vmatmul.mubr.f32.gmra.mxu0 %v352_v4 }
  0xc0   : > { %1776 = vmatprep.mubr.f32.mxu0 %v353_v5 }
  0xc3   : > { %1777 = vmatmul.mubr.f32.gmra.mxu0 %v353_v5 }
  0xc4   : > { %1778 = vmatprep.mubr.f32.mxu0 %v354_v8 }
  0xc7   : > { %1779 = vmatmul.mubr.f32.gmra.mxu0 %v354_v8 }
  0xc8   : > { %1780 = vmatprep.mubr.f32.mxu0 %v355_v9 }
  0xcb   : > { %1781 = vmatmul.mubr.f32.gmra.mxu0 %v355_v9 }
  0xcc   : > { %1782 = vmatprep.mubr.f32.mxu0 %v356_v12 }
  0xcf   : > { %1783 = vmatmul.mubr.f32.gmra.mxu0 %v356_v12 }
  0xd0   : > { %1784 = vmatprep.mubr.f32.mxu0 %v357_v13 }
  0xd3   : > { %1785 = vmatmul.mubr.f32.gmra.mxu0 %v357_v13 }
  0xd4   : > { %1786 = vmatprep.mubr.f32.mxu0 %v358_v15 }
  0xd7   : > { %1787 = vmatmul.mubr.f32.gmra.mxu0 %v358_v15 }
 0x15b   : > { %v2735_v16 = vpop.f32.mrf.mxu0  ;;  %v2737_v17 = vpop.f32.mrf.mxu1 }
 0x15d   : > { %v2739_v18 = vpop.f32.mrf.mxu0  ;;  %v2743_v20 = vpop.f32.mrf.mxu1 }
 0x15e   : > { %v761_v19 = vmax.f32 %v2735_v16, %v2739_v18 }
 0x15f   : > { %v2745_v21 = vpop.f32.mrf.mxu0  ;;  %v2754_v26 = vpop.f32.mrf.mxu1 }
 0x160   : > { %v762_v22 = vmax.f32 %v761_v19, %v2743_v20 }
 0x161   : > { %v2748_v23 = vpop.f32.mrf.mxu0  ;;  %v2761_v30 = vpop.f32.mrf.mxu1 }
 0x162   : > { %v765_v24 = vmax.f32 %v2745_v21, %v2748_v23  ;;  %763 = vmax.xlane.f32.xlu0 %v762_v22 }
 0x163   : > { %v2752_v25 = vpop.f32.mrf.mxu0  ;;  %v2772_v36 = vpop.f32.mrf.mxu1 }
 0x164   : > { %v766_v27 = vmax.f32 %v765_v24, %v2737_v17 }
 0x165   : > { %v2757_v28 = vpop.f32.mrf.mxu0  ;;  %v2779_v40 = vpop.f32.mrf.mxu1 }
 0x166   : > { %v769_v29 = vmax.f32 %v2752_v25, %v2757_v28  ;;  %767 = vmax.xlane.f32.xlu0 %v766_v27 }
 0x167   : > { %v2763_v31 = vpop.f32.mrf.mxu0  ;;  %v2790_v46 = vpop.f32.mrf.mxu1 }
 0x168   : > { %v770_v32 = vmax.f32 %v769_v29, %v2761_v30 }
 0x169   : > { %v2766_v33 = vpop.f32.mrf.mxu0  ;;  %v2797_v50 = vpop.f32.mrf.mxu1 }
 0x16a   : > { %v773_v34 = vmax.f32 %v2763_v31, %v2766_v33  ;;  %771 = vmax.xlane.f32.xlu1 %v770_v32 }
 0x16b   : > { %v2770_v35 = vpop.f32.mrf.mxu0  ;;  %v2808_v56 = vpop.f32.mrf.mxu1 }
 0x16c   : > { %v774_v37 = vmax.f32 %v773_v34, %v2754_v26 }
 0x16d   : > { %v2775_v38 = vpop.f32.mrf.mxu0  ;;  %v2815_v60 = vpop.f32.mrf.mxu1 }
 0x16e   : > { %v777_v39 = vmax.f32 %v2770_v35, %v2775_v38  ;;  %775 = vmax.xlane.f32.xlu1 %v774_v37 }
 0x16f   : > { %v2781_v41 = vpop.f32.mrf.mxu0  ;;  %v2826_v2 = vpop.f32.mrf.mxu1 }
 0x170   : > { %v778_v42 = vmax.f32 %v777_v39, %v2779_v40 }
 0x171   : > { %v2784_v43 = vpop.f32.mrf.mxu0  ;;  %v2833_v6 = vpop.f32.mrf.mxu1 }
 0x172   : > { %v781_v44 = vmax.f32 %v2781_v41, %v2784_v43  ;;  %779 = vmax.xlane.f32.xlu0 %v778_v42 }
 0x173   : > { %v2788_v45 = vpop.f32.mrf.mxu0  ;;  %v2844_v12 = vpop.f32.mrf.mxu1 }
 0x174   : > { %v782_v47 = vmax.f32 %v781_v44, %v2772_v36 }
 0x175   : > { %v2793_v48 = vpop.f32.mrf.mxu0  ;;  %v2851_v19 = vpop.f32.mrf.mxu1 }
 0x176   : > { %v785_v49 = vmax.f32 %v2788_v45, %v2793_v48  ;;  %783 = vmax.xlane.f32.xlu1 %v782_v47 }
 0x177   : > { %v2799_v51 = vpop.f32.mrf.mxu0  ;;  %v2862_v34 = vpop.f32.mrf.mxu1 }
 0x178   : > { %v786_v52 = vmax.f32 %v785_v49, %v2797_v50 }
 0x179   : > { %v2802_v53 = vpop.f32.mrf.mxu0  ;;  %v2869_v44 = vpop.f32.mrf.mxu1 }
 0x17a   : > { %v789_v54 = vmax.f32 %v2799_v51, %v2802_v53  ;;  %787 = vmax.xlane.f32.xlu0 %v786_v52 }
 0x17b   : > { %v2806_v55 = vpop.f32.mrf.mxu0 }
 0x17c   : > { %v790_v57 = vmax.f32 %v789_v54, %v2790_v46 }
 0x17d   : > { %v2811_v58 = vpop.f32.mrf.mxu0 }
 0x17e   : > { %v793_v59 = vmax.f32 %v2806_v55, %v2811_v58  ;;  %791 = vmax.xlane.f32.xlu1 %v790_v57 }
 0x17f   : > { %v2817_v61 = vpop.f32.mrf.mxu0 }
 0x180   : > { %v794_v62 = vmax.f32 %v793_v59, %v2815_v60  ;;  %v438_v59 = vld [vmem:[%s2880_s21 + $0xf8] sm:$0xff] }
 0x181   : > { %v2820_v63 = vpop.f32.mrf.mxu0  ;;  %1820 = vmatprep.subr.mxu1 %v438_v59 }
 0x182   : > { %v797_v0 = vmax.f32 %v2817_v61, %v2820_v63  ;;  %795 = vmax.xlane.f32.xlu0 %v794_v62  ;;  %v422_v62 = vld [vmem:[%s2880_s21 + $0x78] sm:$0xff] }
 0x183   : > { %v2824_v1 = vpop.f32.mrf.mxu0  ;;  %1821 = vmatpush3.msra.mxu1 %v422_v62 }
 0x184   : > { %v798_v3 = vmax.f32 %v797_v0, %v2808_v56  ;;  %v437_v0 = vld [vmem:[%s2880_s21 + $0xf0] sm:$0xff] }
 0x185   : > { %v2829_v4 = vpop.f32.mrf.mxu0  ;;  %1822 = vmatprep.subr.mxu1 %v437_v0 }
 0x186   : > { %v801_v5 = vmax.f32 %v2824_v1, %v2829_v4  ;;  %799 = vmax.xlane.f32.xlu1 %v798_v3  ;;  %v454_v3 = vld [vmem:[%s2880_s21 + $0x178] sm:$0xff] }
 0x187   : > { %v2835_v7 = vpop.f32.mrf.mxu0  ;;  %1988 = vmatprep.subr.mxu0 %v454_v3 }
 0x188   : > { %v802_v8 = vmax.f32 %v801_v5, %v2833_v6  ;;  %v421_v5 = vld [vmem:[%s2880_s21 + $0x70] sm:$0xff]  ;;  %1989 = vmatpush3.msra.mxu0 %v454_v3 }
 0x189   : > { %v2838_v9 = vpop.f32.mrf.mxu0  ;;  %1823 = vmatpush3.msra.mxu1 %v421_v5 }
 0x18a   : > { %v805_v10 = vmax.f32 %v2835_v7, %v2838_v9  ;;  %803 = vmax.xlane.f32.xlu0 %v802_v8  ;;  %v436_v8 = vld [vmem:[%s2880_s21 + $0xe8] sm:$0xff] }
 0x18b   : > { %v2842_v11 = vpop.f32.mrf.mxu0  ;;  %1824 = vmatprep.subr.mxu1 %v436_v8 }
 0x18c   : > { %v806_v13 = vmax.f32 %v805_v10, %v2826_v2  ;;  %v453_v10 = vld [vmem:[%s2880_s21 + $0x170] sm:$0xff] }
 0x18d   : > { %v2847_v14 = vpop.f32.mrf.mxu0  ;;  %1990 = vmatprep.subr.mxu0 %v453_v10 }
 0x18e   : > { %v809_v15 = vmax.f32 %v2842_v11, %v2847_v14  ;;  %807 = vmax.xlane.f32.xlu1 %v806_v13  ;;  %v420_v13 = vld [vmem:[%s2880_s21 + $0x68] sm:$0xff]  ;;  %1991 = vmatpush3.msra.mxu0 %v453_v10 }
 0x18f   : > { %v2853_v22 = vpop.f32.mrf.mxu0  ;;  %1825 = vmatpush3.msra.mxu1 %v420_v13 }
 0x190   : > { %v810_v24 = vmax.f32 %v809_v15, %v2851_v19  ;;  %v452_v15 = vld [vmem:[%s2880_s21 + $0x168] sm:$0xff] }
 0x191   : > { %v2856_v27 = vpop.f32.mrf.mxu0  ;;  %1992 = vmatprep.subr.mxu0 %v452_v15 }
 0x192   : > { %v813_v29 = vmax.f32 %v2853_v22, %v2856_v27  ;;  %811 = vmax.xlane.f32.xlu0 %v810_v24  ;;  %v435_v24 = vld [vmem:[%s2880_s21 + $0xe0] sm:$0xff]  ;;  %1993 = vmatpush3.msra.mxu0 %v452_v15 }
 0x193   : > { %v2860_v32 = vpop.f32.mrf.mxu0  ;;  %1826 = vmatprep.subr.mxu1 %v435_v24 }
 0x194   : > { %v814_v37 = vmax.f32 %v813_v29, %v2844_v12  ;;  %v419_v29 = vld [vmem:[%s2880_s21 + $0x60] sm:$0xff] }
 0x195   : > { %v2865_v39 = vpop.f32.mrf.mxu0  ;;  %1827 = vmatpush3.msra.mxu1 %v419_v29 }
 0x196   : > { %v817_v42 = vmax.f32 %v2860_v32, %v2865_v39  ;;  %815 = vmax.xlane.f32.xlu1 %v814_v37  ;;  %v434_v37 = vld [vmem:[%s2880_s21 + $0xd8] sm:$0xff] }
 0x197   : > { %v2871_v47 = vpop.f32.mrf.mxu0  ;;  %1828 = vmatprep.subr.mxu1 %v434_v37 }
 0x198   : > { %v818_v49 = vmax.f32 %v817_v42, %v2869_v44  ;;  %v418_v42 = vld [vmem:[%s2880_s21 + $0x58] sm:$0xff] }
 0x199   : > { %v2874_v52 = vpop.f32.mrf.mxu0  ;;  %1829 = vmatpush3.msra.mxu1 %v418_v42 }
 0x19a   : > { %v821_v54 = vmax.f32 %v2871_v47, %v2874_v52  ;;  %819 = vmax.xlane.f32.xlu0 %v818_v49 }
 0x19c   : > { %v822_v57 = vmax.f32 %v821_v54, %v2862_v34 }
 0x19e   : > { %823 = vmax.xlane.f32.xlu1 %v822_v57 }
 0x1eb   : > { %v764_v49 = vpop.xlane.xlu0 %763 }
 0x1ec   : > { %v825_v54 = vsub.f32 %v2735_v16, %v764_v49  ;;  %v826_v57 = vsub.f32 %v2739_v18, %v764_v49  ;;  %v827_v59 = vsub.f32 %v2743_v20, %v764_v49 }
 0x1ee   : > { %v873_v62 = vmul.f32 1.442695, %v825_v54  ;;  %v875_v0 = vmul.f32 1.442695, %v826_v57  ;;  %v877_v3 = vmul.f32 1.442695, %v827_v59 }
 0x1ef   : > { %v768_v5 = vpop.xlane.xlu0 %767 }
 0x1f0   : > { %2133 = vpow2.f32 %v873_v62  ;;  %v828_v8 = vsub.f32 %v2745_v21, %v768_v5  ;;  %v829_v10 = vsub.f32 %v2748_v23, %v768_v5  ;;  %v830_v13 = vsub.f32 %v2737_v17, %v768_v5 }
 0x1f1   : > { %2135 = vpow2.f32 %v875_v0 }
 0x1f2   : > { %v879_v15 = vmul.f32 1.442695, %v828_v8  ;;  %v881_v24 = vmul.f32 1.442695, %v829_v10  ;;  %2137 = vpow2.f32 %v877_v3  ;;  %v883_v16 = vmul.f32 1.442695, %v830_v13 }
 0x1f3   : > { %v772_v29 = vpop.xlane.xlu1 %771 }
 0x1f4   : > { %2139 = vpow2.f32 %v879_v15  ;;  %v831_v18 = vsub.f32 %v2752_v25, %v772_v29  ;;  %v832_v20 = vsub.f32 %v2757_v28, %v772_v29  ;;  %v833_v37 = vsub.f32 %v2761_v30, %v772_v29 }
 0x1f5   : > { %2141 = vpow2.f32 %v881_v24 }
 0x1f6   : > { %v885_v42 = vmul.f32 1.442695, %v831_v18  ;;  %v887_v21 = vmul.f32 1.442695, %v832_v20  ;;  %2143 = vpow2.f32 %v883_v16  ;;  %v889_v23 = vmul.f32 1.442695, %v833_v37 }
 0x1f7   : > { %v776_v49 = vpop.xlane.xlu1 %775 }
 0x1f8   : > { %2145 = vpow2.f32 %v885_v42  ;;  %v834_v17 = vsub.f32 %v2763_v31, %v776_v49  ;;  %v835_v54 = vsub.f32 %v2766_v33, %v776_v49  ;;  %v836_v57 = vsub.f32 %v2754_v26, %v776_v49 }
 0x1f9   : > { %2147 = vpow2.f32 %v887_v21 }
 0x1fa   : > { %v891_v59 = vmul.f32 1.442695, %v834_v17  ;;  %v893_v25 = vmul.f32 1.442695, %v835_v54  ;;  %2149 = vpow2.f32 %v889_v23  ;;  %v895_v28 = vmul.f32 1.442695, %v836_v57 }
 0x1fb   : > { %v780_v62 = vpop.xlane.xlu0 %779 }
 0x1fc   : > { %2151 = vpow2.f32 %v891_v59  ;;  %v837_v30 = vsub.f32 %v2770_v35, %v780_v62  ;;  %v838_v0 = vsub.f32 %v2775_v38, %v780_v62  ;;  %v839_v3 = vsub.f32 %v2779_v40, %v780_v62 }
 0x1fd   : > { %v2910_v5 = vpop.eup %2133  ;;  %2153 = vpow2.f32 %v893_v25 }
 0x1fe   : > { %v2912_v31 = vpop.eup %2135  ;;  %v897_v33 = vmul.f32 1.442695, %v837_v30  ;;  %v899_v26 = vmul.f32 1.442695, %v838_v0  ;;  %2155 = vpow2.f32 %v895_v28  ;;  %v901_v8 = vmul.f32 1.442695, %v839_v3 }
 0x1ff   : > { %v784_v10 = vpop.xlane.xlu1 %783  ;;  %v969_v13 = vadd.f32 %v2912_v31, %v2910_v5  ;;  %v2916_v15 = vpop.eup %2137 }
 0x200   : > { %2157 = vpow2.f32 %v897_v33  ;;  %v840_v35 = vsub.f32 %v2781_v41, %v784_v10  ;;  %v841_v38 = vsub.f32 %v2784_v43, %v784_v10  ;;  %v842_v40 = vsub.f32 %v2772_v36, %v784_v10 }
 0x201   : > { %v2921_v24 = vpop.eup %2139  ;;  %2159 = vpow2.f32 %v899_v26  ;;  %v970_v16 = vadd.f32 %v2916_v15, %v969_v13 }
 0x202   : > { %v2924_v29 = vpop.eup %2141  ;;  %v903_v18 = vmul.f32 1.442695, %v840_v35  ;;  %v905_v20 = vmul.f32 1.442695, %v841_v38  ;;  %2161 = vpow2.f32 %v901_v8  ;;  %v907_v37 = vmul.f32 1.442695, %v842_v40 }
 0x203   : > { %971 = vadd.xlane.f32.xlu0 %v970_v16  ;;  %v788_v42 = vpop.xlane.xlu0 %787  ;;  %v973_v41 = vadd.f32 %v2924_v29, %v2921_v24  ;;  %v2928_v21 = vpop.eup %2143 }
 0x204   : > { %2163 = vpow2.f32 %v903_v18  ;;  %v843_v36 = vsub.f32 %v2788_v45, %v788_v42  ;;  %v844_v43 = vsub.f32 %v2793_v48, %v788_v42  ;;  %v845_v23 = vsub.f32 %v2797_v50, %v788_v42  ;;  %v451_v18 = vld [vmem:[%s2880_s21 + $0x160] sm:$0xff] }
 0x205   : > { %v2933_v49 = vpop.eup %2145  ;;  %2165 = vpow2.f32 %v905_v20  ;;  %v974_v17 = vadd.f32 %v2928_v21, %v973_v41  ;;  %1994 = vmatprep.subr.mxu0 %v451_v18  ;;  %v433_v41 = vld [vmem:[%s2880_s21 + $0xd0] sm:$0xff] }
 0x206   : > { %v2936_v54 = vpop.eup %2147  ;;  %v909_v57 = vmul.f32 1.442695, %v843_v36  ;;  %v911_v59 = vmul.f32 1.442695, %v844_v43  ;;  %2167 = vpow2.f32 %v907_v37  ;;  %v913_v25 = vmul.f32 1.442695, %v845_v23  ;;  %1995 = vmatpush3.msra.mxu0 %v451_v18  ;;  %1830 = vmatprep.subr.mxu1 %v433_v41 }
 0x207   : > { %975 = vadd.xlane.f32.xlu1 %v974_v17  ;;  %v792_v28 = vpop.xlane.xlu1 %791  ;;  %v977_v45 = vadd.f32 %v2936_v54, %v2933_v49  ;;  %v2940_v62 = vpop.eup %2149  ;;  %v417_v36 = vld [vmem:[%s2880_s21 + $0x50] sm:$0xff]  ;;  %v450_v43 = vld [vmem:[%s2880_s21 + $0x158] sm:$0xff] }
 0x208   : > { %2169 = vpow2.f32 %v909_v57  ;;  %v846_v48 = vsub.f32 %v2799_v51, %v792_v28  ;;  %v847_v50 = vsub.f32 %v2802_v53, %v792_v28  ;;  %v848_v30 = vsub.f32 %v2790_v46, %v792_v28  ;;  %1996 = vmatprep.subr.mxu0 %v450_v43  ;;  %1831 = vmatpush3.msra.mxu1 %v417_v36  ;;  %v429_v36 = vld [vmem:[%s2880_s21 + $0xb0] sm:$0xff] }
 0x209   : > { %v2945_v0 = vpop.eup %2151  ;;  %2171 = vpow2.f32 %v911_v59  ;;  %v978_v3 = vadd.f32 %v2940_v62, %v977_v45  ;;  %1997 = vmatpush3.msra.mxu0 %v450_v43  ;;  %v413_v43 = vld [vmem:[%s2880_s21 + $0x30] sm:$0xff] }
 0x20a   : > { %v2948_v33 = vpop.eup %2153  ;;  %v915_v26 = vmul.f32 1.442695, %v846_v48  ;;  %v917_v8 = vmul.f32 1.442695, %v847_v50  ;;  %2173 = vpow2.f32 %v913_v25  ;;  %v919_v10 = vmul.f32 1.442695, %v848_v30 }
 0x20b   : > { %979 = vadd.xlane.f32.xlu0 %v978_v3  ;;  %v796_v13 = vpop.xlane.xlu0 %795  ;;  %v981_v51 = vadd.f32 %v2948_v33, %v2945_v0  ;;  %v2952_v53 = vpop.eup %2155  ;;  %v432_v25 = vld [vmem:[%s2880_s21 + $0xc8] sm:$0xff]  ;;  %v449_v50 = vld [vmem:[%s2880_s21 + $0x150] sm:$0xff] }
 0x20c   : > { %2175 = vpow2.f32 %v915_v26  ;;  %v849_v46 = vsub.f32 %v2806_v55, %v796_v13  ;;  %v850_v35 = vsub.f32 %v2811_v58, %v796_v13  ;;  %v851_v38 = vsub.f32 %v2815_v60, %v796_v13  ;;  %v416_v48 = vld [vmem:[%s2880_s21 + $0x48] sm:$0xff]  ;;  %1832 = vmatprep.subr.mxu1 %v432_v25  ;;  %1998 = vmatprep.subr.mxu0 %v449_v50 }
 0x20d   : > { %v2957_v40 = vpop.eup %2157  ;;  %2177 = vpow2.f32 %v917_v8  ;;  %v982_v16 = vadd.f32 %v2952_v53, %v981_v51  ;;  %1833 = vmatpush3.msra.mxu1 %v416_v48  ;;  %v431_v8 = vld [vmem:[%s2880_s21 + $0xc0] sm:$0xff]  ;;  %v448_v13 = vld [vmem:[%s2880_s21 + $0x148] sm:$0xff]  ;;  %1999 = vmatpush3.msra.mxu0 %v449_v50 }
 0x20e   : > { %v2961_v20 = vpop.eup %2159  ;;  %v921_v37 = vmul.f32 1.442695, %v849_v46  ;;  %v923_v42 = vmul.f32 1.442695, %v850_v35  ;;  %2179 = vpow2.f32 %v919_v10  ;;  %v925_v55 = vmul.f32 1.442695, %v851_v38  ;;  %1834 = vmatprep.subr.mxu1 %v431_v8  ;;  %2000 = vmatprep.subr.mxu0 %v448_v13 }
 0x20f   : > { %983 = vadd.xlane.f32.xlu1 %v982_v16  ;;  %v800_v58 = vpop.xlane.xlu1 %799  ;;  %v985_v60 = vadd.f32 %v2961_v20, %v2957_v40  ;;  %v2968_v23 = vpop.eup %2161  ;;  %v415_v10 = vld [vmem:[%s2880_s21 + $0x40] sm:$0xff]  ;;  %v430_v16 = vld [vmem:[%s2880_s21 + $0xb8] sm:$0xff]  ;;  %2001 = vmatpush3.msra.mxu0 %v448_v13  ;;  %v428_v48 = vld [vmem:[%s2880_s21 + $0xa8] sm:$0xff] }
 0x210   : > { %2181 = vpow2.f32 %v921_v37  ;;  %v852_v17 = vsub.f32 %v2817_v61, %v800_v58  ;;  %v853_v57 = vsub.f32 %v2820_v63, %v800_v58  ;;  %v854_v59 = vsub.f32 %v2808_v56, %v800_v58  ;;  %1835 = vmatpush3.msra.mxu1 %v415_v10  ;;  %v427_v10 = vld [vmem:[%s2880_s21 + $0xa0] sm:$0xff] }
 0x211   : > { %v2974_v28 = vpop.eup %2163  ;;  %2183 = vpow2.f32 %v923_v42  ;;  %v986_v45 = vadd.f32 %v2968_v23, %v985_v60  ;;  %v414_v42 = vld [vmem:[%s2880_s21 + $0x38] sm:$0xff]  ;;  %1836 = vmatprep.subr.mxu1 %v430_v16  ;;  %v411_v13 = vld [vmem:[%s2880_s21 + $0x20] sm:$0xff] }
 0x212   : > { %v2979_v61 = vpop.eup %2165  ;;  %v927_v63 = vmul.f32 1.442695, %v852_v17  ;;  %v929_v30 = vmul.f32 1.442695, %v853_v57  ;;  %2185 = vpow2.f32 %v925_v55  ;;  %v931_v56 = vmul.f32 1.442695, %v854_v59  ;;  %1837 = vmatpush3.msra.mxu1 %v414_v42 }
 0x213   : > { %987 = vadd.xlane.f32.xlu0 %v986_v45  ;;  %v804_v3 = vpop.xlane.xlu0 %803  ;;  %v989_v26 = vadd.f32 %v2979_v61, %v2974_v28  ;;  %v2986_v51 = vpop.eup %2167  ;;  %v447_v55 = vld [vmem:[%s2880_s21 + $0x140] sm:$0xff]  ;;  %v446_v17 = vld [vmem:[%s2880_s21 + $0x138] sm:$0xff]  ;;  %1838 = vmatprep.subr.mxu1 %v429_v36  ;;  %v444_v42 = vld [vmem:[%s2880_s21 + $0x128] sm:$0xff] }
 0x214   : > { %2187 = vpow2.f32 %v927_v63  ;;  %v855_v46 = vsub.f32 %v2824_v1, %v804_v3  ;;  %v856_v35 = vsub.f32 %v2829_v4, %v804_v3  ;;  %v857_v38 = vsub.f32 %v2833_v6, %v804_v3  ;;  %2002 = vmatprep.subr.mxu0 %v447_v55  ;;  %1839 = vmatpush3.msra.mxu1 %v413_v43  ;;  %v425_v43 = vld [vmem:[%s2880_s21 + $0x90] sm:$0xff] }
 0x215   : > { %v2992_v18 = vpop.eup %2169  ;;  %2189 = vpow2.f32 %v929_v30  ;;  %v990_v37 = vadd.f32 %v2986_v51, %v989_v26  ;;  %2003 = vmatpush3.msra.mxu0 %v447_v55  ;;  %v412_v30 = vld [vmem:[%s2880_s21 + $0x28] sm:$0xff]  ;;  %1840 = vmatprep.subr.mxu1 %v428_v48 }
 0x216   : > { %v2997_v1 = vpop.eup %2171  ;;  %v933_v4 = vmul.f32 1.442695, %v855_v46  ;;  %v935_v58 = vmul.f32 1.442695, %v856_v35  ;;  %2191 = vpow2.f32 %v931_v56  ;;  %v937_v6 = vmul.f32 1.442695, %v857_v38  ;;  %2004 = vmatprep.subr.mxu0 %v446_v17  ;;  %1841 = vmatpush3.msra.mxu1 %v412_v30 }
 0x217   : > { %991 = vadd.xlane.f32.xlu1 %v990_v37  ;;  %v808_v60 = vpop.xlane.xlu1 %807  ;;  %v993_v41 = vadd.f32 %v2997_v1, %v2992_v18  ;;  %v3004_v57 = vpop.eup %2173  ;;  %2005 = vmatpush3.msra.mxu0 %v446_v17  ;;  %v426_v37 = vld [vmem:[%s2880_s21 + $0x98] sm:$0xff]  ;;  %v409_v17 = vld [vmem:[%s2880_s21 + $0x10] sm:$0xff] }
 0x218   : > { %2193 = vpow2.f32 %v933_v4  ;;  %v858_v59 = vsub.f32 %v2835_v7, %v808_v60  ;;  %v859_v25 = vsub.f32 %v2838_v9, %v808_v60  ;;  %v860_v45 = vsub.f32 %v2826_v2, %v808_v60  ;;  %v445_v2 = vld [vmem:[%s2880_s21 + $0x130] sm:$0xff]  ;;  %1842 = vmatprep.subr.mxu1 %v427_v10  ;;  %v423_v10 = vld [vmem:[%s2880_s21 + $0x80] sm:$0xff] }
 0x219   : > { %v3010_v50 = vpop.eup %2175  ;;  %2195 = vpow2.f32 %v935_v58  ;;  %v994_v63 = vadd.f32 %v3004_v57, %v993_v41  ;;  %2006 = vmatprep.subr.mxu0 %v445_v2  ;;  %1843 = vmatpush3.msra.mxu1 %v411_v13  ;;  %v410_v58 = vld [vmem:[%s2880_s21 + $0x18] sm:$0xff]  ;;  %v441_v13 = vld [vmem:[%s2880_s21 + $0x110] sm:$0xff] }
 0x21a   : > { %v3014_v56 = vpop.eup %2177  ;;  %v939_v7 = vmul.f32 1.442695, %v858_v59  ;;  %v941_v9 = vmul.f32 1.442695, %v859_v25  ;;  %2197 = vpow2.f32 %v937_v6  ;;  %v943_v3 = vmul.f32 1.442695, %v860_v45  ;;  %2007 = vmatpush3.msra.mxu0 %v445_v2  ;;  %1844 = vmatprep.subr.mxu1 %v426_v37 }
 0x21b   : > { %995 = vadd.xlane.f32.xlu0 %v994_v63  ;;  %v812_v26 = vpop.xlane.xlu0 %811  ;;  %v997_v8 = vadd.f32 %v3014_v56, %v3010_v50  ;;  %v3021_v46 = vpop.eup %2179  ;;  %2008 = vmatprep.subr.mxu0 %v444_v42  ;;  %v424_v63 = vld [vmem:[%s2880_s21 + $0x88] sm:$0xff] }
 0x21c   : > { %2199 = vpow2.f32 %v939_v7  ;;  %v861_v35 = vsub.f32 %v2842_v11, %v812_v26  ;;  %v862_v38 = vsub.f32 %v2847_v14, %v812_v26  ;;  %v863_v16 = vsub.f32 %v2851_v19, %v812_v26  ;;  %v443_v19 = vld [vmem:[%s2880_s21 + $0x120] sm:$0xff]  ;;  %1845 = vmatpush3.msra.mxu1 %v410_v58  ;;  %2009 = vmatpush3.msra.mxu0 %v444_v42  ;;  %v408_v2 = vld [vmem:[%s2880_s21 + $0x8] sm:$0xff] }
 0x21d   : > { %v3028_v55 = vpop.eup %2181  ;;  %2201 = vpow2.f32 %v941_v9  ;;  %v998_v4 = vadd.f32 %v3021_v46, %v997_v8  ;;  %1846 = vmatprep.subr.mxu1 %v425_v43  ;;  %2010 = vmatprep.subr.mxu0 %v443_v19  ;;  %v442_v9 = vld [vmem:[%s2880_s21 + $0x118] sm:$0xff] }
 0x21e   : > { %v3032_v11 = vpop.eup %2183  ;;  %v945_v14 = vmul.f32 1.442695, %v861_v35  ;;  %v947_v6 = vmul.f32 1.442695, %v862_v38  ;;  %2203 = vpow2.f32 %v943_v3  ;;  %v949_v60 = vmul.f32 1.442695, %v863_v16  ;;  %1847 = vmatpush3.msra.mxu1 %v409_v17  ;;  %2011 = vmatpush3.msra.mxu0 %v443_v19 }
 0x21f   : > { %999 = vadd.xlane.f32.xlu1 %v998_v4  ;;  %v816_v41 = vpop.xlane.xlu1 %815  ;;  %v1001_v36 = vadd.f32 %v3032_v11, %v3028_v55  ;;  %v3039_v59 = vpop.eup %2185  ;;  %1848 = vmatprep.subr.mxu1 %v424_v63  ;;  %v407_v35 = vld [vmem:[%s2880_s21] sm:$0xff] }
 0x220   : > { %2205 = vpow2.f32 %v945_v14  ;;  %v864_v25 = vsub.f32 %v2853_v22, %v816_v41  ;;  %v865_v45 = vsub.f32 %v2856_v27, %v816_v41  ;;  %v866_v48 = vsub.f32 %v2844_v12, %v816_v41  ;;  %2012 = vmatprep.subr.mxu0 %v442_v9  ;;  %1849 = vmatpush3.msra.mxu1 %v408_v2  ;;  %v440_v14 = vld [vmem:[%s2880_s21 + $0x108] sm:$0xff]  ;;  %v439_v41 = vld [vmem:[%s2880_s21 + $0x100] sm:$0xff] }
 0x221   : > { %v3045_v30 = vpop.eup %2187  ;;  %2207 = vpow2.f32 %v947_v6  ;;  %v1002_v7 = vadd.f32 %v3039_v59, %v1001_v36  ;;  %2013 = vmatpush3.msra.mxu0 %v442_v9  ;;  %1850 = vmatprep.subr.mxu1 %v423_v10 }
 0x222   : > { %v3050_v22 = vpop.eup %2189  ;;  %v951_v27 = vmul.f32 1.442695, %v864_v25  ;;  %v953_v3 = vmul.f32 1.442695, %v865_v45  ;;  %2209 = vpow2.f32 %v949_v60  ;;  %v955_v12 = vmul.f32 1.442695, %v866_v48  ;;  %2014 = vmatprep.subr.mxu0 %v441_v13  ;;  %1851 = vmatpush3.msra.mxu1 %v407_v35 }
 0x223   : > { %1003 = vadd.xlane.f32.xlu0 %v1002_v7  ;;  %v820_v26 = vpop.xlane.xlu0 %819  ;;  %v1005_v8 = vadd.f32 %v3050_v22, %v3045_v30  ;;  %v3057_v38 = vpop.eup %2191  ;;  %2015 = vmatpush3.msra.mxu0 %v441_v13 }
 0x224   : > { %2211 = vpow2.f32 %v951_v27  ;;  %v867_v16 = vsub.f32 %v2860_v32, %v820_v26  ;;  %v868_v37 = vsub.f32 %v2865_v39, %v820_v26  ;;  %v869_v42 = vsub.f32 %v2869_v44, %v820_v26  ;;  %2016 = vmatprep.subr.mxu0 %v440_v14 }
 0x225   : > { %v3062_v4 = vpop.eup %2193  ;;  %2213 = vpow2.f32 %v953_v3  ;;  %v1006_v58 = vadd.f32 %v3057_v38, %v1005_v8  ;;  %2017 = vmatpush3.msra.mxu0 %v440_v14 }
 0x226   : > { %v3066_v6 = vpop.eup %2195  ;;  %v957_v19 = vmul.f32 1.442695, %v867_v16  ;;  %v959_v60 = vmul.f32 1.442695, %v868_v37  ;;  %2215 = vpow2.f32 %v955_v12  ;;  %v961_v32 = vmul.f32 1.442695, %v869_v42  ;;  %2018 = vmatprep.subr.mxu0 %v439_v41 }
 0x227   : > { %1007 = vadd.xlane.f32.xlu1 %v1006_v58  ;;  %v824_v39 = vpop.xlane.xlu1 %823  ;;  %v1009_v44 = vadd.f32 %v3066_v6, %v3062_v4  ;;  %v3071_v36 = vpop.eup %2197  ;;  %2019 = vmatpush3.msra.mxu0 %v439_v41 }
 0x228   : > { %2217 = vpow2.f32 %v957_v19  ;;  %v870_v43 = vsub.f32 %v2871_v47, %v824_v39  ;;  %v871_v17 = vsub.f32 %v2874_v52, %v824_v39  ;;  %v872_v25 = vsub.f32 %v2862_v34, %v824_v39 }
 0x229   : > { %v3076_v45 = vpop.eup %2199  ;;  %2219 = vpow2.f32 %v959_v60  ;;  %v1010_v48 = vadd.f32 %v3071_v36, %v1009_v44 }
 0x22a   : > { %v3079_v63 = vpop.eup %2201  ;;  %v963_v7 = vmul.f32 1.442695, %v870_v43  ;;  %v965_v9 = vmul.f32 1.442695, %v871_v17  ;;  %2221 = vpow2.f32 %v961_v32  ;;  %v967_v2 = vmul.f32 1.442695, %v872_v25 }
 0x22b   : > { %1011 = vadd.xlane.f32.xlu0 %v1010_v48  ;;  %v1013_v47 = vadd.f32 %v3079_v63, %v3076_v45  ;;  %v3083_v34 = vpop.eup %2203 }
 0x22c   : > { %2223 = vpow2.f32 %v963_v7 }
 0x22d   : > { %v3085_v52 = vpop.eup %2205  ;;  %2225 = vpow2.f32 %v965_v9  ;;  %v1014_v27 = vadd.f32 %v3083_v34, %v1013_v47 }
 0x22e   : > { %v3088_v3 = vpop.eup %2207  ;;  %2227 = vpow2.f32 %v967_v2 }
 0x22f   : > { %1015 = vadd.xlane.f32.xlu1 %v1014_v27  ;;  %v1017_v12 = vadd.f32 %v3088_v3, %v3085_v52  ;;  %v3092_v26 = vpop.eup %2209 }
 0x231   : > { %v3094_v8 = vpop.eup %2211  ;;  %v1018_v10 = vadd.f32 %v3092_v26, %v1017_v12 }
 0x232   : > { %v3097_v13 = vpop.eup %2213 }
 0x233   : > { %1019 = vadd.xlane.f32.xlu0 %v1018_v10  ;;  %v1021_v35 = vadd.f32 %v3097_v13, %v3094_v8  ;;  %v3101_v16 = vpop.eup %2215 }
 0x235   : > { %v3103_v37 = vpop.eup %2217  ;;  %v1022_v42 = vadd.f32 %v3101_v16, %v1021_v35 }
 0x236   : > { %v3106_v58 = vpop.eup %2219 }
 0x237   : > { %1023 = vadd.xlane.f32.xlu1 %v1022_v42  ;;  %v1025_v14 = vadd.f32 %v3106_v58, %v3103_v37  ;;  %v3110_v19 = vpop.eup %2221 }
 0x239   : > { %v3112_v60 = vpop.eup %2223  ;;  %v1026_v32 = vadd.f32 %v3110_v19, %v1025_v14 }
 0x23a   : > { %3360 = vst [vmem:[#allocation19_spill] sm:$0xff] %v3112_v60  ;;  %v3115_v39 = vpop.eup %2225 }
 0x23b   : > { %1027 = vadd.xlane.f32.xlu0 %v1026_v32  ;;  %v1029_v44 = vadd.f32 %v3115_v39, %v3112_v60  ;;  %v3119_v41 = vpop.eup %2227 }
 0x23d   : > { %v1030_v43 = vadd.f32 %v3119_v41, %v1029_v44 }
 0x23f   : > { %1031 = vadd.xlane.f32.xlu1 %v1030_v43 }
 0x28c   : > { %v972_v17 = vpop.xlane.xlu0 %971 }
 0x28d   : > { %2229 = vrcp.f32 %v972_v17 }
 0x290   : > { %v976_v25 = vpop.xlane.xlu1 %975 }
 0x291   : > { %2231 = vrcp.f32 %v976_v25 }
 0x294   : > { %v980_v48 = vpop.xlane.xlu0 %979 }
 0x295   : > { %2233 = vrcp.f32 %v980_v48 }
 0x298   : > { %v984_v7 = vpop.xlane.xlu1 %983 }
 0x299   : > { %2235 = vrcp.f32 %v984_v7 }
 0x29a   : > { %v2230_v9 = vpop.eup %2229 }
 0x29b   : > { %v1049_v2 = vmul.f32 %v2230_v9, %v972_v17 }
 0x29c   : > { %v988_v47 = vpop.xlane.xlu0 %987 }
 0x29d   : > { %v1065_v27 = vsub.f32 2.0, %v1049_v2  ;;  %2237 = vrcp.f32 %v988_v47 }
 0x29e   : > { %v2232_v12 = vpop.eup %2231 }
 0x29f   : > { %v1081_v10 = vmul.f32 %v2230_v9, %v1065_v27  ;;  %v1050_v35 = vmul.f32 %v2232_v12, %v976_v25 }
 0x2a0   : > { %v992_v42 = vpop.xlane.xlu1 %991 }
 0x2a1   : > { %v1097_v14 = vmul.f32 %v2910_v5, %v1081_v10  ;;  %v1066_v32 = vsub.f32 2.0, %v1050_v35  ;;  %2239 = vrcp.f32 %v992_v42  ;;  %v1098_v44 = vmul.f32 %v2912_v31, %v1081_v10 }
 0x2a2   : > { %v2234_v43 = vpop.eup %2233  ;;  %v1099_v60 = vmul.f32 %v2916_v15, %v1081_v10 }
 0x2a3   : > { %1145 = vst [vmem:[%s3126_s27] sm:$0xff] %v1097_v14  ;;  %v1082_v17 = vmul.f32 %v2232_v12, %v1066_v32  ;;  %v1051_v9 = vmul.f32 %v2234_v43, %v980_v48  ;;  %1146 = vst [vmem:[%s3126_s27 + $0x8] sm:$0xff] %v1098_v44  ;;  %1257 = vmatprep.mubr.f32.mxu1 %v1098_v44 }
 0x2a4   : > { %1147 = vst [vmem:[%s3126_s27 + $0x10] sm:$0xff] %v1099_v60  ;;  %2020 = vmatprep.mubr.f32.mxu0 %v1099_v60  ;;  %1258 = vmatmul.mubr.f32.vlgmr.msra.gmra.mxu1 %v1097_v14  ;;  %v996_v5 = vpop.xlane.xlu0 %995 }
 0x2a5   : > { %v1102_v31 = vmul.f32 %v2928_v21, %v1082_v17  ;;  %v1067_v15 = vsub.f32 2.0, %v1051_v9  ;;  %2241 = vrcp.f32 %v996_v5  ;;  %v1101_v25 = vmul.f32 %v2924_v29, %v1082_v17 }
 0x2a6   : > { %v2236_v2 = vpop.eup %2235  ;;  %v1100_v27 = vmul.f32 %v2921_v24, %v1082_v17 }
 0x2a7   : > { %1150 = vst [vmem:[%s3126_s27 + $0x28] sm:$0xff] %v1102_v31  ;;  %v1083_v12 = vmul.f32 %v2234_v43, %v1067_v15  ;;  %v1052_v48 = vmul.f32 %v2236_v2, %v984_v7  ;;  %1149 = vst [vmem:[%s3126_s27 + $0x20] sm:$0xff] %v1101_v25  ;;  %1262 = vmatprep.mubr.f32.mxu1 %v1101_v25  ;;  %2021 = vmatmul.mubr.f32.vlgmr.msra.gmra.mxu0 %v1102_v31 }
 0x2a8   : > { %1148 = vst [vmem:[%s3126_s27 + $0x18] sm:$0xff] %v1100_v27  ;;  %1263 = vmatmul.mubr.f32.gmra.mxu1 %v1100_v27  ;;  %v1000_v60 = vpop.xlane.xlu1 %999 }
 0x2a9   : > { %v1068_v21 = vsub.f32 2.0, %v1052_v48  ;;  %2243 = vrcp.f32 %v1000_v60  ;;  %v1104_v10 = vmul.f32 %v2936_v54, %v1083_v12  ;;  %v1105_v29 = vmul.f32 %v2940_v62, %v1083_v12 }
 0x2aa   : > { %v2238_v35 = vpop.eup %2237  ;;  %v1103_v24 = vmul.f32 %v2933_v49, %v1083_v12 }
 0x2ab   : > { %v1084_v14 = vmul.f32 %v2236_v2, %v1068_v21  ;;  %v1053_v32 = vmul.f32 %v2238_v35, %v988_v47  ;;  %1152 = vst [vmem:[%s3126_s27 + $0x38] sm:$0xff] %v1104_v10  ;;  %1267 = vmatprep.mubr.f32.mxu1 %v1104_v10  ;;  %1153 = vst [vmem:[%s3126_s27 + $0x40] sm:$0xff] %v1105_v29  ;;  %2023 = vmatprep.mubr.f32.mxu0 %v1105_v29 }
 0x2ac   : > { %v1004_v7 = vpop.xlane.xlu0 %1003  ;;  %1151 = vst [vmem:[%s3126_s27 + $0x30] sm:$0xff] %v1103_v24  ;;  %1268 = vmatmul.mubr.f32.gmra.mxu1 %v1103_v24 }
 0x2ad   : > { %v1069_v44 = vsub.f32 2.0, %v1053_v32  ;;  %2245 = vrcp.f32 %v1004_v7  ;;  %v1107_v54 = vmul.f32 %v2948_v33, %v1084_v14  ;;  %v1108_v62 = vmul.f32 %v2952_v53, %v1084_v14 }
 0x2ae   : > { %v2240_v43 = vpop.eup %2239  ;;  %v1106_v49 = vmul.f32 %v2945_v0, %v1084_v14 }
 0x2af   : > { %v1085_v47 = vmul.f32 %v2238_v35, %v1069_v44  ;;  %v1054_v17 = vmul.f32 %v2240_v43, %v992_v42  ;;  %1155 = vst [vmem:[%s3126_s27 + $0x50] sm:$0xff] %v1107_v54  ;;  %1272 = vmatprep.mubr.f32.mxu1 %v1107_v54  ;;  %1156 = vst [vmem:[%s3126_s27 + $0x58] sm:$0xff] %v1108_v62  ;;  %2024 = vmatmul.mubr.f32.gmra.mxu0 %v1108_v62 }
 0x2b0   : > { %1154 = vst [vmem:[%s3126_s27 + $0x48] sm:$0xff] %v1106_v49  ;;  %1273 = vmatmul.mubr.f32.gmra.mxu1 %v1106_v49  ;;  %v1008_v9 = vpop.xlane.xlu1 %1007 }
 0x2b1   : > { %v1070_v31 = vsub.f32 2.0, %v1054_v17  ;;  %2247 = vrcp.f32 %v1008_v9  ;;  %v1110_v33 = vmul.f32 %v2961_v20, %v1085_v47  ;;  %v1111_v53 = vmul.f32 %v2968_v23, %v1085_v47 }
 0x2b2   : > { %v2242_v15 = vpop.eup %2241  ;;  %v1109_v0 = vmul.f32 %v2957_v40, %v1085_v47 }
 0x2b3   : > { %v1086_v42 = vmul.f32 %v2240_v43, %v1070_v31  ;;  %v1055_v25 = vmul.f32 %v2242_v15, %v996_v5  ;;  %1158 = vst [vmem:[%s3126_s27 + $0x68] sm:$0xff] %v1110_v33  ;;  %1277 = vmatprep.mubr.f32.mxu1 %v1110_v33  ;;  %1159 = vst [vmem:[%s3126_s27 + $0x70] sm:$0xff] %v1111_v53  ;;  %2026 = vmatprep.mubr.f32.mxu0 %v1111_v53 }
 0x2b4   : > { %v1012_v2 = vpop.xlane.xlu0 %1011  ;;  %1157 = vst [vmem:[%s3126_s27 + $0x60] sm:$0xff] %v1109_v0  ;;  %1278 = vmatmul.mubr.f32.gmra.mxu1 %v1109_v0 }
 0x2b5   : > { %v1071_v27 = vsub.f32 2.0, %v1055_v25  ;;  %2249 = vrcp.f32 %v1012_v2  ;;  %v1113_v20 = vmul.f32 %v2979_v61, %v1086_v42  ;;  %v1114_v23 = vmul.f32 %v2986_v51, %v1086_v42 }
 0x2b6   : > { %v2244_v12 = vpop.eup %2243  ;;  %v1112_v40 = vmul.f32 %v2974_v28, %v1086_v42 }
 0x2b7   : > { %v1087_v5 = vmul.f32 %v2242_v15, %v1071_v27  ;;  %v1056_v48 = vmul.f32 %v2244_v12, %v1000_v60  ;;  %1161 = vst [vmem:[%s3126_s27 + $0x80] sm:$0xff] %v1113_v20  ;;  %1282 = vmatprep.mubr.f32.mxu1 %v1113_v20  ;;  %1162 = vst [vmem:[%s3126_s27 + $0x88] sm:$0xff] %v1114_v23  ;;  %2027 = vmatmul.mubr.f32.gmra.mxu0 %v1114_v23 }
 0x2b8   : > { %1160 = vst [vmem:[%s3126_s27 + $0x78] sm:$0xff] %v1112_v40  ;;  %1283 = vmatmul.mubr.f32.gmra.mxu1 %v1112_v40  ;;  %v1016_v21 = vpop.xlane.xlu1 %1015 }
 0x2b9   : > { %v1072_v10 = vsub.f32 2.0, %v1056_v48  ;;  %2251 = vrcp.f32 %v1016_v21  ;;  %v1116_v61 = vmul.f32 %v2997_v1, %v1087_v5  ;;  %v1117_v51 = vmul.f32 %v3004_v57, %v1087_v5 }
 0x2ba   : > { %v2246_v29 = vpop.eup %2245  ;;  %v1115_v28 = vmul.f32 %v2992_v18, %v1087_v5 }
 0x2bb   : > { %v1088_v60 = vmul.f32 %v2244_v12, %v1072_v10  ;;  %v1057_v35 = vmul.f32 %v2246_v29, %v1004_v7  ;;  %1164 = vst [vmem:[%s3126_s27 + $0x98] sm:$0xff] %v1116_v61  ;;  %1287 = vmatprep.mubr.f32.mxu1 %v1116_v61  ;;  %1165 = vst [vmem:[%s3126_s27 + $0xa0] sm:$0xff] %v1117_v51  ;;  %2029 = vmatprep.mubr.f32.mxu0 %v1117_v51 }
 0x2bc   : > { %v1020_v24 = vpop.xlane.xlu0 %1019  ;;  %1163 = vst [vmem:[%s3126_s27 + $0x90] sm:$0xff] %v1115_v28  ;;  %1288 = vmatmul.mubr.f32.gmra.mxu1 %v1115_v28 }
 0x2bd   : > { %v1073_v14 = vsub.f32 2.0, %v1057_v35  ;;  %2253 = vrcp.f32 %v1020_v24  ;;  %v1119_v1 = vmul.f32 %v3014_v56, %v1088_v60  ;;  %v1120_v57 = vmul.f32 %v3021_v46, %v1088_v60 }
 0x2be   : > { %v2248_v32 = vpop.eup %2247  ;;  %v1118_v18 = vmul.f32 %v3010_v50, %v1088_v60 }
 0x2bf   : > { %v1089_v7 = vmul.f32 %v2246_v29, %v1073_v14  ;;  %v1058_v44 = vmul.f32 %v2248_v32, %v1008_v9  ;;  %1167 = vst [vmem:[%s3126_s27 + $0xb0] sm:$0xff] %v1119_v1  ;;  %1292 = vmatprep.mubr.f32.mxu1 %v1119_v1  ;;  %1168 = vst [vmem:[%s3126_s27 + $0xb8] sm:$0xff] %v1120_v57  ;;  %2030 = vmatmul.mubr.f32.gmra.mxu0 %v1120_v57 }
 0x2c0   : > { %1166 = vst [vmem:[%s3126_s27 + $0xa8] sm:$0xff] %v1118_v18  ;;  %1293 = vmatmul.mubr.f32.gmra.mxu1 %v1118_v18  ;;  %v1024_v54 = vpop.xlane.xlu1 %1023 }
 0x2c1   : > { %v1074_v62 = vsub.f32 2.0, %v1058_v44  ;;  %2255 = vrcp.f32 %v1024_v54  ;;  %v1122_v56 = vmul.f32 %v3032_v11, %v1089_v7  ;;  %v1123_v46 = vmul.f32 %v3039_v59, %v1089_v7 }
 0x2c2   : > { %v2250_v43 = vpop.eup %2249  ;;  %v1121_v50 = vmul.f32 %v3028_v55, %v1089_v7 }
 0x2c3   : > { %v1090_v49 = vmul.f32 %v2248_v32, %v1074_v62  ;;  %v1059_v47 = vmul.f32 %v2250_v43, %v1012_v2  ;;  %1170 = vst [vmem:[%s3126_s27 + $0xc8] sm:$0xff] %v1122_v56  ;;  %1297 = vmatprep.mubr.f32.mxu1 %v1122_v56  ;;  %1171 = vst [vmem:[%s3126_s27 + $0xd0] sm:$0xff] %v1123_v46  ;;  %2032 = vmatprep.mubr.f32.mxu0 %v1123_v46 }
 0x2c4   : > { %v1028_v17 = vpop.xlane.xlu0 %1027  ;;  %1169 = vst [vmem:[%s3126_s27 + $0xc0] sm:$0xff] %v1121_v50  ;;  %1298 = vmatmul.mubr.f32.gmra.mxu1 %v1121_v50 }
 0x2c5   : > { %v1075_v9 = vsub.f32 2.0, %v1059_v47  ;;  %2257 = vrcp.f32 %v1028_v17  ;;  %v1125_v11 = vmul.f32 %v3050_v22, %v1090_v49  ;;  %v1126_v59 = vmul.f32 %v3057_v38, %v1090_v49 }
 0x2c6   : > { %v2252_v31 = vpop.eup %2251  ;;  %v1124_v55 = vmul.f32 %v3045_v30, %v1090_v49 }
 0x2c7   : > { %v1091_v33 = vmul.f32 %v2250_v43, %v1075_v9  ;;  %v1060_v53 = vmul.f32 %v2252_v31, %v1016_v21  ;;  %1173 = vst [vmem:[%s3126_s27 + $0xe0] sm:$0xff] %v1125_v11  ;;  %1302 = vmatprep.mubr.f32.mxu1 %v1125_v11  ;;  %1174 = vst [vmem:[%s3126_s27 + $0xe8] sm:$0xff] %v1126_v59  ;;  %2033 = vmatmul.mubr.f32.gmra.mxu0 %v1126_v59 }
 0x2c8   : > { %1172 = vst [vmem:[%s3126_s27 + $0xd8] sm:$0xff] %v1124_v55  ;;  %1303 = vmatmul.mubr.f32.gmra.mxu1 %v1124_v55  ;;  %v1032_v15 = vpop.xlane.xlu1 %1031 }
 0x2c9   : > { %v1076_v0 = vsub.f32 2.0, %v1060_v53  ;;  %2259 = vrcp.f32 %v1032_v15  ;;  %v1128_v22 = vmul.f32 %v3066_v6, %v1091_v33  ;;  %v1129_v38 = vmul.f32 %v3071_v36, %v1091_v33 }
 0x2ca   : > { %v2254_v42 = vpop.eup %2253  ;;  %v1127_v30 = vmul.f32 %v3062_v4, %v1091_v33 }
 0x2cb   : > { %v1092_v25 = vmul.f32 %v2252_v31, %v1076_v0  ;;  %v1061_v2 = vmul.f32 %v2254_v42, %v1020_v24  ;;  %1176 = vst [vmem:[%s3126_s27 + $0xf8] sm:$0xff] %v1128_v22  ;;  %1307 = vmatprep.mubr.f32.mxu1 %v1128_v22  ;;  %1177 = vst [vmem:[%s3126_s27 + $0x100] sm:$0xff] %v1129_v38  ;;  %2035 = vmatprep.mubr.f32.mxu0 %v1129_v38  ;;  %v3361_v24 = vld [vmem:[#allocation19_spill] sm:$0xff] }
 0x2cc   : > { %1175 = vst [vmem:[%s3126_s27 + $0xf0] sm:$0xff] %v1127_v30  ;;  %1308 = vmatmul.mubr.f32.gmra.mxu1 %v1127_v30 }
 0x2cd   : > { %v1077_v27 = vsub.f32 2.0, %v1061_v2  ;;  %v1131_v20 = vmul.f32 %v3079_v63, %v1092_v25  ;;  %v1132_v6 = vmul.f32 %v3083_v34, %v1092_v25  ;;  %v1130_v36 = vmul.f32 %v3076_v45, %v1092_v25 }
 0x2ce   : > { %v2256_v23 = vpop.eup %2255 }
 0x2cf   : > { %v1093_v4 = vmul.f32 %v2254_v42, %v1077_v27  ;;  %v1062_v12 = vmul.f32 %v2256_v23, %v1024_v54  ;;  %1179 = vst [vmem:[%s3126_s27 + $0x110] sm:$0xff] %v1131_v20  ;;  %1312 = vmatprep.mubr.f32.mxu1 %v1131_v20  ;;  %1180 = vst [vmem:[%s3126_s27 + $0x118] sm:$0xff] %v1132_v6  ;;  %2036 = vmatmul.mubr.f32.gmra.mxu0 %v1132_v6 }
 0x2d0   : > { %1178 = vst [vmem:[%s3126_s27 + $0x108] sm:$0xff] %v1130_v36  ;;  %1313 = vmatmul.mubr.f32.gmra.mxu1 %v1130_v36 }
 0x2d1   : > { %v1078_v40 = vsub.f32 2.0, %v1062_v12  ;;  %v1134_v5 = vmul.f32 %v3088_v3, %v1093_v4  ;;  %v1135_v63 = vmul.f32 %v3092_v26, %v1093_v4  ;;  %v1133_v34 = vmul.f32 %v3085_v52, %v1093_v4 }
 0x2d2   : > { %v2258_v45 = vpop.eup %2257 }
 0x2d3   : > { %v1094_v48 = vmul.f32 %v2256_v23, %v1078_v40  ;;  %v1063_v21 = vmul.f32 %v2258_v45, %v1028_v17  ;;  %1182 = vst [vmem:[%s3126_s27 + $0x128] sm:$0xff] %v1134_v5  ;;  %1317 = vmatprep.mubr.f32.mxu1 %v1134_v5  ;;  %1183 = vst [vmem:[%s3126_s27 + $0x130] sm:$0xff] %v1135_v63  ;;  %2038 = vmatprep.mubr.f32.mxu0 %v1135_v63 }
 0x2d4   : > { %1181 = vst [vmem:[%s3126_s27 + $0x120] sm:$0xff] %v1133_v34  ;;  %1318 = vmatmul.mubr.f32.gmra.mxu1 %v1133_v34 }
 0x2d5   : > { %v1079_v10 = vsub.f32 2.0, %v1063_v21  ;;  %v1137_v61 = vmul.f32 %v3097_v13, %v1094_v48  ;;  %v1138_v3 = vmul.f32 %v3101_v16, %v1094_v48  ;;  %v1136_v52 = vmul.f32 %v3094_v8, %v1094_v48 }
 0x2d6   : > { %v2260_v26 = vpop.eup %2259 }
 0x2d7   : > { %v1095_v51 = vmul.f32 %v2258_v45, %v1079_v10  ;;  %v1064_v29 = vmul.f32 %v2260_v26, %v1032_v15  ;;  %1185 = vst [vmem:[%s3126_s27 + $0x140] sm:$0xff] %v1137_v61  ;;  %1322 = vmatprep.mubr.f32.mxu1 %v1137_v61  ;;  %1186 = vst [vmem:[%s3126_s27 + $0x148] sm:$0xff] %v1138_v3  ;;  %2039 = vmatmul.mubr.f32.gmra.mxu0 %v1138_v3 }
 0x2d8   : > { %1184 = vst [vmem:[%s3126_s27 + $0x138] sm:$0xff] %v1136_v52  ;;  %1323 = vmatmul.mubr.f32.gmra.mxu1 %v1136_v52 }
 0x2d9   : > { %v1080_v28 = vsub.f32 2.0, %v1064_v29  ;;  %v1140_v13 = vmul.f32 %v3106_v58, %v1095_v51  ;;  %v1141_v16 = vmul.f32 %v3110_v19, %v1095_v51  ;;  %v1139_v8 = vmul.f32 %v3103_v37, %v1095_v51 }
 0x2db   : > { %v1096_v60 = vmul.f32 %v2260_v26, %v1080_v28  ;;  %1188 = vst [vmem:[%s3126_s27 + $0x158] sm:$0xff] %v1140_v13  ;;  %1327 = vmatprep.mubr.f32.mxu1 %v1140_v13  ;;  %1189 = vst [vmem:[%s3126_s27 + $0x160] sm:$0xff] %v1141_v16  ;;  %2041 = vmatprep.mubr.f32.mxu0 %v1141_v16 }
 0x2dc   : > { %1187 = vst [vmem:[%s3126_s27 + $0x150] sm:$0xff] %v1139_v8  ;;  %1328 = vmatmul.mubr.f32.gmra.mxu1 %v1139_v8 }
 0x2dd   : > { %v1143_v35 = vmul.f32 %v3115_v39, %v1096_v60  ;;  %v1144_v58 = vmul.f32 %v3119_v41, %v1096_v60  ;;  %v1142_v19 = vmul.f32 %v3361_v24, %v1096_v60 }
 0x2df   : > { %1191 = vst [vmem:[%s3126_s27 + $0x170] sm:$0xff] %v1143_v35  ;;  %1332 = vmatprep.mubr.f32.mxu1 %v1143_v35  ;;  %1192 = vst [vmem:[%s3126_s27 + $0x178] sm:$0xff] %v1144_v58  ;;  %2042 = vmatmul.mubr.f32.gmra.mxu0 %v1144_v58 }
 0x2e0   : > { %1190 = vst [vmem:[%s3126_s27 + $0x168] sm:$0xff] %v1142_v19  ;;  %1333 = vmatmul.mubr.f32.gmra.mxu1 %v1142_v19 }
 0x2e1   : > { %2358 = shalt.err (!%p2355_p12)
}
 0x2e2   : > { %s2359_s26 = scalar_lea.hbm %s3225_s23, 6144  ;;  %s2363_s22 = scalar_lea.hbm %s3332_s4, 12288 }
 0x2e3   : > { %p2360_p1 = scmp.ne.s32.totalorder %s3225_s23, %s2359_s26  ;;  %p2364_p6 = scmp.lt.s32.totalorder %s3225_s23, %s3332_s4 }
 0x2e4   : > { %p2365_p7 = scmp.lt.s32.totalorder %s2363_s22, %s2359_s26 }
 0x2e5   : > { %p2361_p2 = pnand %p2360_p1, %p2552_p9 }
 0x2e6   : > { %p2366_p8 = por %p2365_p7, %p2364_p6 }
 0x2e7   : > { %p2362_p5 = pneg %p2361_p2 }
 0x2e9   : > { %p2367_p0 = pnand %p2366_p8, %p2362_p5 }
 0x2eb   : > { %2370 = shalt.err (!%p2367_p0)
}
 0x2ec   : > { %s2467_s12 = smov 384   ;;  %s2468_s21 = smov 24  }
 0x2ed   : > { %2057 = dma.vmem_to_hbm [thread:$0]  (%p2552_p9), %s3228_s29, 6144, %s3225_s23, %s1505_s9, %s2467_s12, %s2467_s12, %s2468_s21  }
 0x2ee   : > { %s3255_s27 = scalar_lea.vmem [#allocation8], %s1714_s5  ;;  %s1723_s5 = sshll.u32 %s2451_s18, 11 }
 0x2ef   : > { %s1520_s14 = sshll.u32 %s3255_s27, 4  ;;  %s3277_s23 = scalar_lea.hbm %s3331_s3, %s1723_s5  ;;  %s3279_s14 = int_to_ptr.vmem [resolvable:$true] %s1520_s14 }
 0x2f0   : > { %s1500_s29 = scalar_lea.sflag [#allocation4], %s2643_s1  ;;  %s2371_s9 = scalar_lea.vmem %s3279_s14, 2048 }
 0x2f1   : > { %p2372_p3 = scmp.ne.s32.totalorder %s3279_s14, %s2371_s9  ;;  %s2469_s18 = smov [#allocation8]  }
 0x2f2   : > { %s2375_s24 = sshll.u32 %s2469_s18, 4  ;;  %s2376_s24 = int_to_ptr.vmem [resolvable:$false] %s2375_s24 }
 0x2f3   : > { %p2373_p4 = pnand %p2372_p3, %p2552_p9  ;;  %s2377_s7 = scalar_lea.vmem %s2376_s24, 4096 }
 0x2f4   : > { %p2378_p13 = scmp.lt.s32.totalorder %s3279_s14, %s2376_s24  ;;  %p2379_p12 = scmp.lt.s32.totalorder %s2377_s7, %s2371_s9 }
 0x2f5   : > { %p2374_p10 = pneg %p2373_p4 }
 0x2f6   : > { %p2380_p1 = por %p2379_p12, %p2378_p13 }
 0x2f8   : > { %p2381_p2 = pnand %p2380_p1, %p2374_p10 }
 0x364   : > { %v1852_v37 = vpop.f32.mrf.mxu1 }
 0x366   : > { %v1853_v39 = vpop.f32.mrf.mxu1 }
 0x367   : > { %v1854_v41 = vadd.f32 %v1853_v39, %v1852_v37  ;;  %v2022_v14 = vpop.f32.mrf.mxu0 }
 0x368   : > { %v1855_v1 = vpop.f32.mrf.mxu1 }
 0x369   : > { %v1404_v57 = vpop.f32.mrf.mxu0 }
 0x36a   : > { %v1405_v32 = vadd.f32 %v1854_v41, %v1404_v57  ;;  %v1856_v18 = vpop.f32.mrf.mxu1 }
 0x36b   : > { %v1857_v7 = vadd.f32 %v1856_v18, %v1855_v1 }
 0x36c   : > { %1483 = vst [vmem:[%s3255_s27] sm:$0xff] %v1405_v32  ;;  %v1858_v44 = vpop.f32.mrf.mxu1 }
 0x36d   : > { %v1410_v54 = vadd.f32 %v2022_v14, %v1857_v7 }
 0x36e   : > { %v1859_v62 = vpop.f32.mrf.mxu1 }
 0x36f   : > { %1484 = vst [vmem:[%s3255_s27 + $0x8] sm:$0xff] %v1410_v54  ;;  %v1860_v56 = vadd.f32 %v1859_v62, %v1858_v44  ;;  %v2025_v46 = vpop.f32.mrf.mxu0 }
 0x370   : > { %v1861_v43 = vpop.f32.mrf.mxu1 }
 0x371   : > { %v1414_v50 = vpop.f32.mrf.mxu0 }
 0x372   : > { %v1415_v49 = vadd.f32 %v1860_v56, %v1414_v50  ;;  %v1862_v47 = vpop.f32.mrf.mxu1 }
 0x373   : > { %v1863_v17 = vadd.f32 %v1862_v47, %v1861_v43 }
 0x374   : > { %1485 = vst [vmem:[%s3255_s27 + $0x10] sm:$0xff] %v1415_v49  ;;  %v1864_v9 = vpop.f32.mrf.mxu1 }
 0x375   : > { %v1420_v11 = vadd.f32 %v2025_v46, %v1863_v17 }
 0x376   : > { %v1865_v59 = vpop.f32.mrf.mxu1 }
 0x377   : > { %1486 = vst [vmem:[%s3255_s27 + $0x18] sm:$0xff] %v1420_v11  ;;  %v1866_v31 = vadd.f32 %v1865_v59, %v1864_v9  ;;  %v2028_v55 = vpop.f32.mrf.mxu0 }
 0x378   : > { %v1867_v33 = vpop.f32.mrf.mxu1 }
 0x379   : > { %v1424_v53 = vpop.f32.mrf.mxu0 }
 0x37a   : > { %v1425_v15 = vadd.f32 %v1866_v31, %v1424_v53  ;;  %v1868_v0 = vpop.f32.mrf.mxu1 }
 0x37b   : > { %v1869_v22 = vadd.f32 %v1868_v0, %v1867_v33 }
 0x37c   : > { %1487 = vst [vmem:[%s3255_s27 + $0x20] sm:$0xff] %v1425_v15  ;;  %v1870_v38 = vpop.f32.mrf.mxu1 }
 0x37d   : > { %v1430_v42 = vadd.f32 %v2028_v55, %v1869_v22 }
 0x37e   : > { %v1871_v30 = vpop.f32.mrf.mxu1 }
 0x37f   : > { %1488 = vst [vmem:[%s3255_s27 + $0x28] sm:$0xff] %v1430_v42  ;;  %v1872_v25 = vadd.f32 %v1871_v30, %v1870_v38  ;;  %v2031_v2 = vpop.f32.mrf.mxu0 }
 0x380   : > { %v1873_v27 = vpop.f32.mrf.mxu1 }
 0x381   : > { %v1434_v20 = vpop.f32.mrf.mxu0 }
 0x382   : > { %v1435_v6 = vadd.f32 %v1872_v25, %v1434_v20  ;;  %v1874_v36 = vpop.f32.mrf.mxu1 }
 0x383   : > { %v1875_v23 = vadd.f32 %v1874_v36, %v1873_v27 }
 0x384   : > { %1489 = vst [vmem:[%s3255_s27 + $0x30] sm:$0xff] %v1435_v6  ;;  %v1876_v4 = vpop.f32.mrf.mxu1 }
 0x385   : > { %v1440_v12 = vadd.f32 %v2031_v2, %v1875_v23 }
 0x386   : > { %v1877_v40 = vpop.f32.mrf.mxu1 }
 0x387   : > { %1490 = vst [vmem:[%s3255_s27 + $0x38] sm:$0xff] %v1440_v12  ;;  %v1878_v5 = vadd.f32 %v1877_v40, %v1876_v4  ;;  %v2034_v63 = vpop.f32.mrf.mxu0 }
 0x388   : > { %v1879_v34 = vpop.f32.mrf.mxu1 }
 0x389   : > { %v1444_v45 = vpop.f32.mrf.mxu0 }
 0x38a   : > { %v1445_v48 = vadd.f32 %v1878_v5, %v1444_v45  ;;  %v1880_v21 = vpop.f32.mrf.mxu1 }
 0x38b   : > { %v1881_v10 = vadd.f32 %v1880_v21, %v1879_v34 }
 0x38c   : > { %1491 = vst [vmem:[%s3255_s27 + $0x40] sm:$0xff] %v1445_v48  ;;  %v1882_v61 = vpop.f32.mrf.mxu1 }
 0x38d   : > { %v1450_v3 = vadd.f32 %v2034_v63, %v1881_v10 }
 0x38e   : > { %v1883_v52 = vpop.f32.mrf.mxu1 }
 0x38f   : > { %1492 = vst [vmem:[%s3255_s27 + $0x48] sm:$0xff] %v1450_v3  ;;  %v1884_v26 = vadd.f32 %v1883_v52, %v1882_v61  ;;  %v2037_v51 = vpop.f32.mrf.mxu0 }
 0x390   : > { %v1885_v29 = vpop.f32.mrf.mxu1 }
 0x391   : > { %v1454_v28 = vpop.f32.mrf.mxu0 }
 0x392   : > { %v1455_v13 = vadd.f32 %v1884_v26, %v1454_v28  ;;  %v1886_v16 = vpop.f32.mrf.mxu1 }
 0x393   : > { %v1887_v8 = vadd.f32 %v1886_v16, %v1885_v29 }
 0x394   : > { %1493 = vst [vmem:[%s3255_s27 + $0x50] sm:$0xff] %v1455_v13  ;;  %v1888_v60 = vpop.f32.mrf.mxu1 }
 0x395   : > { %v1460_v35 = vadd.f32 %v2037_v51, %v1887_v8 }
 0x396   : > { %v1889_v58 = vpop.f32.mrf.mxu1 }
 0x397   : > { %1494 = vst [vmem:[%s3255_s27 + $0x58] sm:$0xff] %v1460_v35  ;;  %v1890_v24 = vadd.f32 %v1889_v58, %v1888_v60  ;;  %v2040_v19 = vpop.f32.mrf.mxu0 }
 0x398   : > { %v1891_v37 = vpop.f32.mrf.mxu1 }
 0x399   : > { %v1464_v39 = vpop.f32.mrf.mxu0 }
 0x39a   : > { %v1465_v41 = vadd.f32 %v1890_v24, %v1464_v39  ;;  %v1892_v14 = vpop.f32.mrf.mxu1 }
 0x39b   : > { %v1893_v1 = vadd.f32 %v1892_v14, %v1891_v37 }
 0x39c   : > { %1495 = vst [vmem:[%s3255_s27 + $0x60] sm:$0xff] %v1465_v41  ;;  %v1894_v57 = vpop.f32.mrf.mxu1 }
 0x39d   : > { %v1470_v32 = vadd.f32 %v2040_v19, %v1893_v1 }
 0x39e   : > { %v1895_v18 = vpop.f32.mrf.mxu1 }
 0x39f   : > { %1496 = vst [vmem:[%s3255_s27 + $0x68] sm:$0xff] %v1470_v32  ;;  %v1896_v7 = vadd.f32 %v1895_v18, %v1894_v57  ;;  %v2043_v44 = vpop.f32.mrf.mxu0 }
 0x3a0   : > { %v1897_v54 = vpop.f32.mrf.mxu1 }
 0x3a1   : > { %v1474_v62 = vpop.f32.mrf.mxu0 }
 0x3a2   : > { %v1475_v56 = vadd.f32 %v1896_v7, %v1474_v62  ;;  %v1898_v46 = vpop.f32.mrf.mxu1 }
 0x3a3   : > { %v1899_v43 = vadd.f32 %v1898_v46, %v1897_v54 }
 0x3a4   : > { %1497 = vst [vmem:[%s3255_s27 + $0x70] sm:$0xff] %v1475_v56 }
 0x3a5   : > { %v1480_v50 = vadd.f32 %v2043_v44, %v1899_v43 }
 0x3a7   : > { %1498 = vst [vmem:[%s3255_s27 + $0x78] sm:$0xff] %v1480_v50 }
 0x3a8   : > { %2384 = shalt.err (!%p2381_p2)
}
 0x3a9   : > { %s2385_s20 = scalar_lea.hbm %s3277_s23, 2048  ;;  %s2389_s8 = scalar_lea.hbm %s3331_s3, 4096 }
 0x3aa   : > { %p2386_p5 = scmp.ne.s32.totalorder %s3277_s23, %s2385_s20  ;;  %p2390_p8 = scmp.lt.s32.totalorder %s3277_s23, %s3331_s3 }
 0x3ab   : > { %p2391_p0 = scmp.lt.s32.totalorder %s2389_s8, %s2385_s20 }
 0x3ac   : > { %p2387_p6 = pnand %p2386_p5, %p2552_p9 }
 0x3ad   : > { %p2392_p3 = por %p2391_p0, %p2390_p8 }
 0x3ae   : > { %p2388_p7 = pneg %p2387_p6 }
 0x3b0   : > { %p2393_p4 = pnand %p2392_p3, %p2388_p7 }
 0x3b2   : > { %2396 = shalt.err (!%p2393_p4)
}
 0x3b3   : > { %s2470_s13 = smov 128   ;;  %s2471_s10 = smov 8  }
 0x3b4   : > { %2056 = dma.vmem_to_hbm [thread:$0]  (%p2552_p9), %s3279_s14, 2048, %s3277_s23, %s1500_s29, %s2470_s13, %s2470_s13, %s2471_s10  }
 0x3b5 PF: > { %s3362_s12 = sld [smem:[#allocation16_spill]]  ;;  %s1554_s21 = sand.u32 1, %s2439_s15  }
 0x3b6   : > { %s1555_s27 = scalar_lea.sflag [#allocation4], %s1554_s21 }
 0x3bb   : > { %p3363_p10 = scmp.ge.s32.totalorder %s3362_s12, 2 }
 0x3bd   : > { %p2071_p13 = pnand %p3363_p10, %p2559_p11 }
 0x3bf   : > { %p2072_p12 = pneg %p2071_p13 }
 0x3c1   : > { %2430 = dma.done.wait (%p2072_p12), %s1555_s27, 2048  }
 0x3c2   : > { %2432 = vsyncadd (%p2072_p12), %s1555_s27, 4294965248  ;;  %s1564_s5 = scalar_lea.sflag [#allocation10], %s1554_s21 }
 0x3c3   : > { %2434 = dma.done.wait (%p2072_p12), %s1564_s5, 6144  }
 0x3c4   : > { %2436 = vsyncadd (%p2072_p12), %s1564_s5, 4294961152  ;;  %s27_s20 = sadd.s32 1, %s3362_s12   ;;  %s3364_s28 = sld [smem:[#allocation15_spill]] }
 0x3c5   : > { %p24_p1 = scmp.ge.s32.totalorder %s27_s20, 4   ;;  %s3365_s17 = sld [smem:[#allocation18_spill]] }
 0x3c6   : > { %s3366_s1 = sld [smem:[#allocation17_spill]]  ;;  %s3367_s15 = smov %s2443_s16 }
 0x3c7   : > { %s3369_s18 = smov %s2455_s19 }
 0x3c8   :  { %26 = sbr.rel (!%p24_p1) target bundleno = 12 (0xc), region = 118 }
 0x3ca   : > { %s3368_s16 = smov %s3364_s28 }
 0x3cc   : > { %s3370_s19 = smov %s3366_s1 }
 0x3cd   :  { %1569 = vsyncpa [#allocation3], 1 }
 0x3ce   :  { %1571 = vsyncpa [#allocation3 + $0x1], 1 }
 0x3cf   :  { %1572 = vsyncpa [#allocation6], 1 }
 0x3d0   :  { %1574 = vsyncpa [#allocation6 + $0x1], 1 }
 0x3d1   :  { %1575 = vsyncpa [#allocation4], 1 }
 0x3d2   :  { %1577 = vsyncpa [#allocation4 + $0x1], 1 }
 0x3d3   :  { %1578 = vsyncpa [#allocation10], 1 }
 0x3d4   :  { %1580 = vsyncpa [#allocation10 + $0x1], 1 }

</bundles_post_ra>
